<compile_context>
chip_gen: v7x
topology: tpu7x:2x2x1
jax: 0.10.0
libtpu: 0.0.40
codegen_flags: <defaults>
</compile_context>

<pallas_src>
import numpy as np
import jax
import jax.numpy as jnp
from jax.experimental import pallas as pl
from jax.experimental.pallas import tpu as pltpu


def trend_block_kernel(x_ref, wconv_ref, bconv_ref, maskp_ref, maskn_ref,
                       maskfs_ref, wbigb_ref, bbigb_ref, wbigf_ref, bbigf_ref,
                       wmap_ref, bmap_ref, sel_ref,
                       backcast_ref, forecast_ref):
    W = x_ref.shape[2]                    # nb * L packed lanes
    nb = backcast_ref.shape[0]
    Lb = backcast_ref.shape[2]
    Lf = forecast_ref.shape[1]
    Wf = sel_ref.shape[0]                 # nb * Lf

    maskp = maskp_ref[...]                # (1, W) bf16: 1 where the l-1 tap is valid
    maskn = maskn_ref[...]                # (1, W) bf16: 1 where the l+1 tap is valid

    # 4 x (Conv1d k=3, pad=1) + ReLU.  Shifted taps via XLU lane rolls with
    # per-batch-segment boundary masks; three accumulating bf16 MXU dots per
    # layer (no (3C, W) concat), f32 accumulator / bias / ReLU.
    h = x_ref[0]                          # (C, W) f32
    for layer in range(4):
        hb = h.astype(jnp.bfloat16)
        h_prev = pltpu.roll(h, 1, 1).astype(jnp.bfloat16) * maskp      # h[:, l-1]
        h_next = pltpu.roll(h, W - 1, 1).astype(jnp.bfloat16) * maskn  # h[:, l+1]
        acc = jnp.dot(wconv_ref[3 * layer + 1], hb,
                      preferred_element_type=jnp.float32)
        acc = acc + jnp.dot(wconv_ref[3 * layer + 0], h_prev,
                            preferred_element_type=jnp.float32)
        acc = acc + jnp.dot(wconv_ref[3 * layer + 2], h_next,
                            preferred_element_type=jnp.float32)
        h = jnp.maximum(acc + bconv_ref[layer], 0.0)

    # Fused theta_fc + trend bases (block-diagonal over the nb batch segments).
    hb = h.astype(jnp.bfloat16)
    out_b = jnp.dot(hb, wbigb_ref[...],
                    preferred_element_type=jnp.float32) + bbigb_ref[...]  # (C, nb*Lb)
    out_f = jnp.dot(hb, wbigf_ref[...],
                    preferred_element_type=jnp.float32) + bbigf_ref[...]  # (C, nb*Lf)

    # Backcast: batch-major slab stores -> no wrapper-side transpose HBM pass.
    for i in range(nb):
        backcast_ref[i] = out_b[:, i * Lb:(i + 1) * Lb]

    # Forecast: per-segment max via a masked roll-max tree (lane 0 of each
    # Lf-lane segment ends up holding the segment max), then ONE selection
    # matmul + ONE forecast_map matmul + ONE store.
    cur = out_f
    s, j = 1, 0
    while s < Lf:
        cand = pltpu.roll(cur, Wf - s, 1)                 # cur[:, l+s]
        take = maskfs_ref[j] > 0.5                        # same-segment lanes only
        cur = jnp.where(take, jnp.maximum(cur, cand), cur)
        s *= 2
        j += 1
    pooled = jnp.dot(cur.astype(jnp.bfloat16), sel_ref[...],
                     preferred_element_type=jnp.float32)              # (C, nb)
    fc = jnp.dot(wmap_ref[...], pooled.astype(jnp.bfloat16),
                 preferred_element_type=jnp.float32) + bmap_ref[...]  # (Lf, nb)
    forecast_ref[0] = fc


def trend_block(x, params):
    B, C, L = x.shape
    Lb = params["wtb"].shape[0]
    Lf = params["wtf"].shape[1]
    assert L == Lb, "input length must equal backcast_length"

    # Lane packing: nb batches per grid step.  Keep tiles 128-lane dense and
    # widen toward ~512 lanes at real batch sizes (but never over-pad a tiny
    # batch; 512 keeps the block-diagonal basis small for v7x's 64MiB VMEM).
    if 128 % L == 0:
        nb = 128 // L
    else:
        nb = 1   # TODO(synk): pad L up to a lane-aligned length for arbitrary L.
    while nb * L < 512 and nb < max(B, 1):
        nb *= 2
    G = -(-B // nb)
    B_pad = G * nb

    if B_pad != B:
        x = jnp.pad(x, ((0, B_pad - B), (0, 0), (0, 0)))
    # (B_pad, C, L) -> (G, C, nb*L): nb batches packed along the lane axis.
    xp = x.reshape(G, nb, C, L).transpose(0, 2, 1, 3).reshape(G, C, nb * L)
    W = nb * L
    Wf = nb * Lf

    # Per-batch-segment boundary masks for the rolled conv taps (bf16: exact 0/1).
    pos = np.arange(W) % L
    maskp = jnp.asarray((pos != 0).astype(np.float32)[None, :], jnp.bfloat16)
    maskn = jnp.asarray((pos != L - 1).astype(np.float32)[None, :], jnp.bfloat16)

    # Roll-max-tree masks for the forecast pooling (shift s valid if pos_f < Lf - s).
    shifts = []
    s = 1
    while s < Lf:
        shifts.append(s)
        s *= 2
    posf = np.arange(Wf) % Lf
    if shifts:
        maskfs = np.stack([(posf < (Lf - sh)).astype(np.float32) for sh in shifts])
    else:
        maskfs = np.zeros((1, Wf), np.float32)            # dummy, unused
    maskfs = jnp.asarray(maskfs[:, None, :])              # (n_steps, 1, Wf)
    nsteps = maskfs.shape[0]

    # 0/1 selection matrix picking lane 0 of each forecast segment.
    sel_np = np.zeros((Wf, nb), np.float32)
    sel_np[np.arange(nb) * Lf, np.arange(nb)] = 1.0
    sel = jnp.asarray(sel_np, jnp.bfloat16)

    # Conv weights per (layer, tap): (12, C, C) bf16.
    wconv = jnp.transpose(params["wconv_pt"], (0, 3, 1, 2)).reshape(12, C, C)
    wconv = wconv.astype(jnp.bfloat16)
    bconv = params["bconv"]                                # (4, C, 1) f32

    # Block-diagonal fused theta_fc*basis weights (bf16 MXU operands, f32 bias).
    eye = jnp.eye(nb, dtype=jnp.float32)
    wbigb = jnp.kron(eye, params["wtb"]).astype(jnp.bfloat16)   # (W, nb*Lb)
    wbigf = jnp.kron(eye, params["wtf"]).astype(jnp.bfloat16)   # (W, nb*Lf)
    bbigb = jnp.tile(params["btb"], (1, nb))                     # (1, nb*Lb)
    bbigf = jnp.tile(params["btf"], (1, nb))                     # (1, nb*Lf)

    wmap = params["wmap"].astype(jnp.bfloat16)             # (Lf, C)
    bmap = params["bmap"].T                                 # (Lf, 1) f32

    def const_spec(shape):
        n = len(shape)
        return pl.BlockSpec(shape, lambda g, _n=n: (0,) * _n)

    grid_spec = pltpu.PrefetchScalarGridSpec(
        num_scalar_prefetch=0,
        grid=(G,),
        in_specs=[
            pl.BlockSpec((1, C, W), lambda g: (g, 0, 0)),   # packed activations
            const_spec((12, C, C)),                         # conv tap weights (bf16)
            const_spec((4, C, 1)),                          # conv biases (f32)
            const_spec((1, W)),                             # prev-tap mask
            const_spec((1, W)),                             # next-tap mask
            const_spec((nsteps, 1, Wf)),                    # roll-max-tree masks
            const_spec((W, nb * Lb)),                       # fused backcast basis
            const_spec((1, nb * Lb)),                       # fused backcast bias
            const_spec((W, Wf)),                            # fused forecast basis
            const_spec((1, Wf)),                            # fused forecast bias
            const_spec((Lf, C)),                            # forecast_map weight
            const_spec((Lf, 1)),                            # forecast_map bias
            const_spec((Wf, nb)),                           # segment-pick selection
        ],
        out_specs=[
            pl.BlockSpec((nb, C, Lb), lambda g: (g, 0, 0)),  # batch-major backcast
            pl.BlockSpec((1, Lf, nb), lambda g: (g, 0, 0)),  # packed forecast
        ],
    )
    backcast_p, forecast_p = pl.pallas_call(
        trend_block_kernel,
        out_shape=(jax.ShapeDtypeStruct((B_pad, C, Lb), jnp.float32),
                   jax.ShapeDtypeStruct((G, Lf, nb), jnp.float32)),
        grid_spec=grid_spec,
        compiler_params=pltpu.CompilerParams(
            dimension_semantics=("parallel",),
            vmem_limit_bytes=32 * 1024 * 1024),
    )(xp, wconv, bconv, maskp, maskn, maskfs,
      wbigb, bbigb, wbigf, bbigf, wmap, bmap, sel)

    backcast = backcast_p[:B]                                         # no transpose pass
    forecast = forecast_p.transpose(0, 2, 1).reshape(B_pad, Lf)[:B]   # tiny tensor
    return backcast, forecast


def init_params(key, C, p, Lb, Lf):
    """Deterministic synthetic parameters (PyTorch-like uniform init scales)."""
    ks = jax.random.split(key, 6)
    bc = 1.0 / np.sqrt(C * 3)        # Conv1d default bound
    wconv_pt = jax.random.uniform(ks[0], (4, C, C, 3), jnp.float32, -bc, bc)
    bconv = jax.random.uniform(ks[1], (4, C, 1), jnp.float32, -bc, bc)

    bt = 1.0 / np.sqrt(Lb)           # Linear(Lb, p) bound (shared theta_b/theta_f fc)
    wtheta = jax.random.uniform(ks[2], (Lb, p), jnp.float32, -bt, bt)   # weight^T
    btheta = jax.random.uniform(ks[3], (1, p), jnp.float32, -bt, bt)

    bm = 1.0 / np.sqrt(C)            # Linear(C, Lf) bound
    wmap = jax.random.uniform(ks[4], (Lf, C), jnp.float32, -bm, bm)     # PyTorch layout
    bmap = jax.random.uniform(ks[5], (1, Lf), jnp.float32, -bm, bm)

    # linspace() + trend_model basis matrices (host-side, like the module __init__).
    lin = np.linspace(-Lb, Lf, Lb + Lf, endpoint=False)
    b_ls = lin[:Lb] / (Lb + Lf)
    f_ls = lin[Lb:] / (Lb + Lf)
    tb = jnp.asarray(np.stack([b_ls ** i for i in range(p)]), jnp.float32)   # (p, Lb)
    tf = jnp.asarray(np.stack([f_ls ** i for i in range(p)]), jnp.float32)   # (p, Lf)

    # Fused theta_fc + basis (eliminates the p<=4 lane-starved intermediate).
    wtb = wtheta @ tb                # (Lb, Lb)
    wtf = wtheta @ tf                # (Lb, Lf)
    btb = btheta @ tb                # (1, Lb)
    btf = btheta @ tf                # (1, Lf)

    return dict(wconv_pt=wconv_pt, bconv=bconv,
                wtheta=wtheta, btheta=btheta, tb=tb, tf=tf,
                wtb=wtb, wtf=wtf, btb=btb, btf=btf,
                wmap=wmap, bmap=bmap)


def reference(x, params):
    """Pure-JAX f32 reference mirroring the PyTorch forward."""
    def conv1d(h, w, b):   # h (B,C,L), w (Cout,Cin,3), b (C,1)
        L = h.shape[-1]
        hp = jnp.pad(h, ((0, 0), (0, 0), (1, 1)))
        out = b[None, :, :]
        for k in range(3):
            out = out + jnp.einsum("oi,bil->bol", w[:, :, k], hp[:, :, k:k + L])
        return out

    h = x
    for layer in range(4):
        h = jax.nn.relu(conv1d(h, params["wconv_pt"][layer], params["bconv"][layer]))
    theta = jnp.einsum("bcl,lp->bcp", h, params["wtheta"]) + params["btheta"][0]
    backcast = jnp.einsum("bcp,pl->bcl", theta, params["tb"])
    fc = jnp.einsum("bcp,pl->bcl", theta, params["tf"])
    pooled = jnp.max(fc, axis=-1)                                    # (B, C)
    forecast = pooled @ params["wmap"].T + params["bmap"][0]         # (B, Lf)
    return backcast, forecast


if __name__ == "__main__":
    B, C = 2, 32                 # batch, hidden_channels
    thetas_dim = 4               # p <= 4
    backcast_length = 16
    forecast_length = 8

    key = jax.random.PRNGKey(0)
    kx, kp = jax.random.split(key)
    x = jax.random.normal(kx, (B, C, backcast_length), jnp.float32)
    params = init_params(kp, C, thetas_dim, backcast_length, forecast_length)

    backcast, forecast = jax.block_until_ready(trend_block(x, params))

    bc_ref, fc_ref = reference(x, params)
    # bf16 MXU operands (f32 accumulation) -> loosened parity tolerance.
    np.testing.assert_allclose(np.asarray(backcast), np.asarray(bc_ref), rtol=2e-2, atol=2e-2)
    np.testing.assert_allclose(np.asarray(forecast), np.asarray(fc_ref), rtol=2e-2, atol=2e-2)
    assert backcast.shape == (B, C, backcast_length)
    assert forecast.shape == (B, forecast_length)

    print("KERNEL_OK")
</pallas_src>

<mosaic_0001>
module attributes {stable_mosaic.version = 11 : i64} {
  func.func @trend_block_kernel(%arg0: i32, %arg1: memref<1x32x128xf32, #tpu.memory_space<vmem>>, %arg2: memref<12x32x32xbf16, #tpu.memory_space<vmem>>, %arg3: memref<4x32x1xf32, #tpu.memory_space<vmem>>, %arg4: memref<1x128xbf16, #tpu.memory_space<vmem>>, %arg5: memref<1x128xbf16, #tpu.memory_space<vmem>>, %arg6: memref<3x1x64xf32, #tpu.memory_space<vmem>>, %arg7: memref<128x128xbf16, #tpu.memory_space<vmem>>, %arg8: memref<1x128xf32, #tpu.memory_space<vmem>>, %arg9: memref<128x64xbf16, #tpu.memory_space<vmem>>, %arg10: memref<1x64xf32, #tpu.memory_space<vmem>>, %arg11: memref<8x32xbf16, #tpu.memory_space<vmem>>, %arg12: memref<8x1xf32, #tpu.memory_space<vmem>>, %arg13: memref<64x8xbf16, #tpu.memory_space<vmem>>, %arg14: memref<8x32x16xf32, #tpu.memory_space<vmem>>, %arg15: memref<1x8x8xf32, #tpu.memory_space<vmem>>) attributes {dimension_semantics = [#tpu.dimension_semantics<parallel>], iteration_bounds = array<i64: 1>, scalar_prefetch = 0 : i64, scratch_operands = 0 : i64, tpu.core_type = #tpu.core_type<tc>, window_params = [{transform_indices = @transform_0, window_bounds = array<i64: 1, 32, 128>}, {pipeline_mode = #tpu.pipeline_mode<synchronous>, transform_indices = @transform_1, window_bounds = array<i64: 12, 32, 32>}, {pipeline_mode = #tpu.pipeline_mode<synchronous>, transform_indices = @transform_2, window_bounds = array<i64: 4, 32, 1>}, {pipeline_mode = #tpu.pipeline_mode<synchronous>, transform_indices = @transform_3, window_bounds = array<i64: 1, 128>}, {pipeline_mode = #tpu.pipeline_mode<synchronous>, transform_indices = @transform_4, window_bounds = array<i64: 1, 128>}, {pipeline_mode = #tpu.pipeline_mode<synchronous>, transform_indices = @transform_5, window_bounds = array<i64: 3, 1, 64>}, {pipeline_mode = #tpu.pipeline_mode<synchronous>, transform_indices = @transform_6, window_bounds = array<i64: 128, 128>}, {pipeline_mode = #tpu.pipeline_mode<synchronous>, transform_indices = @transform_7, window_bounds = array<i64: 1, 128>}, {pipeline_mode = #tpu.pipeline_mode<synchronous>, transform_indices = @transform_8, window_bounds = array<i64: 128, 64>}, {pipeline_mode = #tpu.pipeline_mode<synchronous>, transform_indices = @transform_9, window_bounds = array<i64: 1, 64>}, {pipeline_mode = #tpu.pipeline_mode<synchronous>, transform_indices = @transform_10, window_bounds = array<i64: 8, 32>}, {pipeline_mode = #tpu.pipeline_mode<synchronous>, transform_indices = @transform_11, window_bounds = array<i64: 8, 1>}, {pipeline_mode = #tpu.pipeline_mode<synchronous>, transform_indices = @transform_12, window_bounds = array<i64: 64, 8>}, {transform_indices = @transform_13, window_bounds = array<i64: 8, 32, 16>}, {transform_indices = @transform_14, window_bounds = array<i64: 1, 8, 8>}]} {
    %c0 = arith.constant 0 : index
    %c0_0 = arith.constant 0 : index
    %0 = vector.load %arg4[%c0, %c0_0] : memref<1x128xbf16, #tpu.memory_space<vmem>>, vector<1x128xbf16>
    %c0_1 = arith.constant 0 : index
    %c0_2 = arith.constant 0 : index
    %1 = vector.load %arg5[%c0_1, %c0_2] : memref<1x128xbf16, #tpu.memory_space<vmem>>, vector<1x128xbf16>
    %c0_3 = arith.constant 0 : index
    %c0_4 = arith.constant 0 : index
    %c0_5 = arith.constant 0 : index
    %2 = vector.load %arg1[%c0_3, %c0_4, %c0_5] : memref<1x32x128xf32, #tpu.memory_space<vmem>>, vector<1x32x128xf32>
    %3 = vector.shape_cast %2 : vector<1x32x128xf32> to vector<32x128xf32>
    %4 = arith.truncf %3 : vector<32x128xf32> to vector<32x128xbf16>
    %c1_i32 = arith.constant 1 : i32
    %5 = tpu.dynamic_rotate %3 by %c1_i32 dim 1 : vector<32x128xf32>, i32 -> vector<32x128xf32>
    %6 = arith.truncf %5 : vector<32x128xf32> to vector<32x128xbf16>
    %7 = vector.broadcast %0 : vector<1x128xbf16> to vector<32x128xbf16>
    %8 = arith.mulf %6, %7 : vector<32x128xbf16>
    %c127_i32 = arith.constant 127 : i32
    %9 = tpu.dynamic_rotate %3 by %c127_i32 dim 1 : vector<32x128xf32>, i32 -> vector<32x128xf32>
    %10 = arith.truncf %9 : vector<32x128xf32> to vector<32x128xbf16>
    %11 = vector.broadcast %1 : vector<1x128xbf16> to vector<32x128xbf16>
    %12 = arith.mulf %10, %11 : vector<32x128xbf16>
    %c1 = arith.constant 1 : index
    %c0_6 = arith.constant 0 : index
    %c0_7 = arith.constant 0 : index
    %13 = vector.load %arg2[%c1, %c0_6, %c0_7] : memref<12x32x32xbf16, #tpu.memory_space<vmem>>, vector<1x32x32xbf16>
    %14 = vector.shape_cast %13 : vector<1x32x32xbf16> to vector<32x32xbf16>
    %cst = arith.constant dense<0.000000e+00> : vector<32x128xf32>
    %15 = tpu.matmul %14, %4, %cst {dimension_numbers = #tpu.dot_dimension_numbers<[1], [0], [0], [1], [0, 0, 1, 1], [], []>} : vector<32x32xbf16>, vector<32x128xbf16>, vector<32x128xf32> -> vector<32x128xf32>
    %c0_8 = arith.constant 0 : index
    %c0_9 = arith.constant 0 : index
    %c0_10 = arith.constant 0 : index
    %16 = vector.load %arg2[%c0_8, %c0_9, %c0_10] : memref<12x32x32xbf16, #tpu.memory_space<vmem>>, vector<1x32x32xbf16>
    %17 = vector.shape_cast %16 : vector<1x32x32xbf16> to vector<32x32xbf16>
    %cst_11 = arith.constant dense<0.000000e+00> : vector<32x128xf32>
    %18 = tpu.matmul %17, %8, %cst_11 {dimension_numbers = #tpu.dot_dimension_numbers<[1], [0], [0], [1], [0, 0, 1, 1], [], []>} : vector<32x32xbf16>, vector<32x128xbf16>, vector<32x128xf32> -> vector<32x128xf32>
    %19 = arith.addf %15, %18 : vector<32x128xf32>
    %c2 = arith.constant 2 : index
    %c0_12 = arith.constant 0 : index
    %c0_13 = arith.constant 0 : index
    %20 = vector.load %arg2[%c2, %c0_12, %c0_13] : memref<12x32x32xbf16, #tpu.memory_space<vmem>>, vector<1x32x32xbf16>
    %21 = vector.shape_cast %20 : vector<1x32x32xbf16> to vector<32x32xbf16>
    %cst_14 = arith.constant dense<0.000000e+00> : vector<32x128xf32>
    %22 = tpu.matmul %21, %12, %cst_14 {dimension_numbers = #tpu.dot_dimension_numbers<[1], [0], [0], [1], [0, 0, 1, 1], [], []>} : vector<32x32xbf16>, vector<32x128xbf16>, vector<32x128xf32> -> vector<32x128xf32>
    %23 = arith.addf %19, %22 : vector<32x128xf32>
    %c0_15 = arith.constant 0 : index
    %c0_16 = arith.constant 0 : index
    %c0_17 = arith.constant 0 : index
    %24 = vector.load %arg3[%c0_15, %c0_16, %c0_17] : memref<4x32x1xf32, #tpu.memory_space<vmem>>, vector<1x32x1xf32>
    %25 = vector.shape_cast %24 : vector<1x32x1xf32> to vector<32x1xf32>
    %26 = vector.broadcast %25 : vector<32x1xf32> to vector<32x128xf32>
    %27 = arith.addf %23, %26 : vector<32x128xf32>
    %cst_18 = arith.constant 0.000000e+00 : f32
    %28 = vector.broadcast %cst_18 : f32 to vector<32x128xf32>
    %29 = arith.maximumf %27, %28 : vector<32x128xf32>
    %30 = arith.truncf %29 : vector<32x128xf32> to vector<32x128xbf16>
    %c1_i32_19 = arith.constant 1 : i32
    %31 = tpu.dynamic_rotate %29 by %c1_i32_19 dim 1 : vector<32x128xf32>, i32 -> vector<32x128xf32>
    %32 = arith.truncf %31 : vector<32x128xf32> to vector<32x128xbf16>
    %33 = vector.broadcast %0 : vector<1x128xbf16> to vector<32x128xbf16>
    %34 = arith.mulf %32, %33 : vector<32x128xbf16>
    %c127_i32_20 = arith.constant 127 : i32
    %35 = tpu.dynamic_rotate %29 by %c127_i32_20 dim 1 : vector<32x128xf32>, i32 -> vector<32x128xf32>
    %36 = arith.truncf %35 : vector<32x128xf32> to vector<32x128xbf16>
    %37 = vector.broadcast %1 : vector<1x128xbf16> to vector<32x128xbf16>
    %38 = arith.mulf %36, %37 : vector<32x128xbf16>
    %c4 = arith.constant 4 : index
    %c0_21 = arith.constant 0 : index
    %c0_22 = arith.constant 0 : index
    %39 = vector.load %arg2[%c4, %c0_21, %c0_22] : memref<12x32x32xbf16, #tpu.memory_space<vmem>>, vector<1x32x32xbf16>
    %40 = vector.shape_cast %39 : vector<1x32x32xbf16> to vector<32x32xbf16>
    %cst_23 = arith.constant dense<0.000000e+00> : vector<32x128xf32>
    %41 = tpu.matmul %40, %30, %cst_23 {dimension_numbers = #tpu.dot_dimension_numbers<[1], [0], [0], [1], [0, 0, 1, 1], [], []>} : vector<32x32xbf16>, vector<32x128xbf16>, vector<32x128xf32> -> vector<32x128xf32>
    %c3 = arith.constant 3 : index
    %c0_24 = arith.constant 0 : index
    %c0_25 = arith.constant 0 : index
    %42 = vector.load %arg2[%c3, %c0_24, %c0_25] : memref<12x32x32xbf16, #tpu.memory_space<vmem>>, vector<1x32x32xbf16>
    %43 = vector.shape_cast %42 : vector<1x32x32xbf16> to vector<32x32xbf16>
    %cst_26 = arith.constant dense<0.000000e+00> : vector<32x128xf32>
    %44 = tpu.matmul %43, %34, %cst_26 {dimension_numbers = #tpu.dot_dimension_numbers<[1], [0], [0], [1], [0, 0, 1, 1], [], []>} : vector<32x32xbf16>, vector<32x128xbf16>, vector<32x128xf32> -> vector<32x128xf32>
    %45 = arith.addf %41, %44 : vector<32x128xf32>
    %c5 = arith.constant 5 : index
    %c0_27 = arith.constant 0 : index
    %c0_28 = arith.constant 0 : index
    %46 = vector.load %arg2[%c5, %c0_27, %c0_28] : memref<12x32x32xbf16, #tpu.memory_space<vmem>>, vector<1x32x32xbf16>
    %47 = vector.shape_cast %46 : vector<1x32x32xbf16> to vector<32x32xbf16>
    %cst_29 = arith.constant dense<0.000000e+00> : vector<32x128xf32>
    %48 = tpu.matmul %47, %38, %cst_29 {dimension_numbers = #tpu.dot_dimension_numbers<[1], [0], [0], [1], [0, 0, 1, 1], [], []>} : vector<32x32xbf16>, vector<32x128xbf16>, vector<32x128xf32> -> vector<32x128xf32>
    %49 = arith.addf %45, %48 : vector<32x128xf32>
    %c1_30 = arith.constant 1 : index
    %c0_31 = arith.constant 0 : index
    %c0_32 = arith.constant 0 : index
    %50 = vector.load %arg3[%c1_30, %c0_31, %c0_32] : memref<4x32x1xf32, #tpu.memory_space<vmem>>, vector<1x32x1xf32>
    %51 = vector.shape_cast %50 : vector<1x32x1xf32> to vector<32x1xf32>
    %52 = vector.broadcast %51 : vector<32x1xf32> to vector<32x128xf32>
    %53 = arith.addf %49, %52 : vector<32x128xf32>
    %cst_33 = arith.constant 0.000000e+00 : f32
    %54 = vector.broadcast %cst_33 : f32 to vector<32x128xf32>
    %55 = arith.maximumf %53, %54 : vector<32x128xf32>
    %56 = arith.truncf %55 : vector<32x128xf32> to vector<32x128xbf16>
    %c1_i32_34 = arith.constant 1 : i32
    %57 = tpu.dynamic_rotate %55 by %c1_i32_34 dim 1 : vector<32x128xf32>, i32 -> vector<32x128xf32>
    %58 = arith.truncf %57 : vector<32x128xf32> to vector<32x128xbf16>
    %59 = vector.broadcast %0 : vector<1x128xbf16> to vector<32x128xbf16>
    %60 = arith.mulf %58, %59 : vector<32x128xbf16>
    %c127_i32_35 = arith.constant 127 : i32
    %61 = tpu.dynamic_rotate %55 by %c127_i32_35 dim 1 : vector<32x128xf32>, i32 -> vector<32x128xf32>
    %62 = arith.truncf %61 : vector<32x128xf32> to vector<32x128xbf16>
    %63 = vector.broadcast %1 : vector<1x128xbf16> to vector<32x128xbf16>
    %64 = arith.mulf %62, %63 : vector<32x128xbf16>
    %c7 = arith.constant 7 : index
    %c0_36 = arith.constant 0 : index
    %c0_37 = arith.constant 0 : index
    %65 = vector.load %arg2[%c7, %c0_36, %c0_37] : memref<12x32x32xbf16, #tpu.memory_space<vmem>>, vector<1x32x32xbf16>
    %66 = vector.shape_cast %65 : vector<1x32x32xbf16> to vector<32x32xbf16>
    %cst_38 = arith.constant dense<0.000000e+00> : vector<32x128xf32>
    %67 = tpu.matmul %66, %56, %cst_38 {dimension_numbers = #tpu.dot_dimension_numbers<[1], [0], [0], [1], [0, 0, 1, 1], [], []>} : vector<32x32xbf16>, vector<32x128xbf16>, vector<32x128xf32> -> vector<32x128xf32>
    %c6 = arith.constant 6 : index
    %c0_39 = arith.constant 0 : index
    %c0_40 = arith.constant 0 : index
    %68 = vector.load %arg2[%c6, %c0_39, %c0_40] : memref<12x32x32xbf16, #tpu.memory_space<vmem>>, vector<1x32x32xbf16>
    %69 = vector.shape_cast %68 : vector<1x32x32xbf16> to vector<32x32xbf16>
    %cst_41 = arith.constant dense<0.000000e+00> : vector<32x128xf32>
    %70 = tpu.matmul %69, %60, %cst_41 {dimension_numbers = #tpu.dot_dimension_numbers<[1], [0], [0], [1], [0, 0, 1, 1], [], []>} : vector<32x32xbf16>, vector<32x128xbf16>, vector<32x128xf32> -> vector<32x128xf32>
    %71 = arith.addf %67, %70 : vector<32x128xf32>
    %c8 = arith.constant 8 : index
    %c0_42 = arith.constant 0 : index
    %c0_43 = arith.constant 0 : index
    %72 = vector.load %arg2[%c8, %c0_42, %c0_43] : memref<12x32x32xbf16, #tpu.memory_space<vmem>>, vector<1x32x32xbf16>
    %73 = vector.shape_cast %72 : vector<1x32x32xbf16> to vector<32x32xbf16>
    %cst_44 = arith.constant dense<0.000000e+00> : vector<32x128xf32>
    %74 = tpu.matmul %73, %64, %cst_44 {dimension_numbers = #tpu.dot_dimension_numbers<[1], [0], [0], [1], [0, 0, 1, 1], [], []>} : vector<32x32xbf16>, vector<32x128xbf16>, vector<32x128xf32> -> vector<32x128xf32>
    %75 = arith.addf %71, %74 : vector<32x128xf32>
    %c2_45 = arith.constant 2 : index
    %c0_46 = arith.constant 0 : index
    %c0_47 = arith.constant 0 : index
    %76 = vector.load %arg3[%c2_45, %c0_46, %c0_47] : memref<4x32x1xf32, #tpu.memory_space<vmem>>, vector<1x32x1xf32>
    %77 = vector.shape_cast %76 : vector<1x32x1xf32> to vector<32x1xf32>
    %78 = vector.broadcast %77 : vector<32x1xf32> to vector<32x128xf32>
    %79 = arith.addf %75, %78 : vector<32x128xf32>
    %cst_48 = arith.constant 0.000000e+00 : f32
    %80 = vector.broadcast %cst_48 : f32 to vector<32x128xf32>
    %81 = arith.maximumf %79, %80 : vector<32x128xf32>
    %82 = arith.truncf %81 : vector<32x128xf32> to vector<32x128xbf16>
    %c1_i32_49 = arith.constant 1 : i32
    %83 = tpu.dynamic_rotate %81 by %c1_i32_49 dim 1 : vector<32x128xf32>, i32 -> vector<32x128xf32>
    %84 = arith.truncf %83 : vector<32x128xf32> to vector<32x128xbf16>
    %85 = vector.broadcast %0 : vector<1x128xbf16> to vector<32x128xbf16>
    %86 = arith.mulf %84, %85 : vector<32x128xbf16>
    %c127_i32_50 = arith.constant 127 : i32
    %87 = tpu.dynamic_rotate %81 by %c127_i32_50 dim 1 : vector<32x128xf32>, i32 -> vector<32x128xf32>
    %88 = arith.truncf %87 : vector<32x128xf32> to vector<32x128xbf16>
    %89 = vector.broadcast %1 : vector<1x128xbf16> to vector<32x128xbf16>
    %90 = arith.mulf %88, %89 : vector<32x128xbf16>
    %c10 = arith.constant 10 : index
    %c0_51 = arith.constant 0 : index
    %c0_52 = arith.constant 0 : index
    %91 = vector.load %arg2[%c10, %c0_51, %c0_52] : memref<12x32x32xbf16, #tpu.memory_space<vmem>>, vector<1x32x32xbf16>
    %92 = vector.shape_cast %91 : vector<1x32x32xbf16> to vector<32x32xbf16>
    %cst_53 = arith.constant dense<0.000000e+00> : vector<32x128xf32>
    %93 = tpu.matmul %92, %82, %cst_53 {dimension_numbers = #tpu.dot_dimension_numbers<[1], [0], [0], [1], [0, 0, 1, 1], [], []>} : vector<32x32xbf16>, vector<32x128xbf16>, vector<32x128xf32> -> vector<32x128xf32>
    %c9 = arith.constant 9 : index
    %c0_54 = arith.constant 0 : index
    %c0_55 = arith.constant 0 : index
    %94 = vector.load %arg2[%c9, %c0_54, %c0_55] : memref<12x32x32xbf16, #tpu.memory_space<vmem>>, vector<1x32x32xbf16>
    %95 = vector.shape_cast %94 : vector<1x32x32xbf16> to vector<32x32xbf16>
    %cst_56 = arith.constant dense<0.000000e+00> : vector<32x128xf32>
    %96 = tpu.matmul %95, %86, %cst_56 {dimension_numbers = #tpu.dot_dimension_numbers<[1], [0], [0], [1], [0, 0, 1, 1], [], []>} : vector<32x32xbf16>, vector<32x128xbf16>, vector<32x128xf32> -> vector<32x128xf32>
    %97 = arith.addf %93, %96 : vector<32x128xf32>
    %c11 = arith.constant 11 : index
    %c0_57 = arith.constant 0 : index
    %c0_58 = arith.constant 0 : index
    %98 = vector.load %arg2[%c11, %c0_57, %c0_58] : memref<12x32x32xbf16, #tpu.memory_space<vmem>>, vector<1x32x32xbf16>
    %99 = vector.shape_cast %98 : vector<1x32x32xbf16> to vector<32x32xbf16>
    %cst_59 = arith.constant dense<0.000000e+00> : vector<32x128xf32>
    %100 = tpu.matmul %99, %90, %cst_59 {dimension_numbers = #tpu.dot_dimension_numbers<[1], [0], [0], [1], [0, 0, 1, 1], [], []>} : vector<32x32xbf16>, vector<32x128xbf16>, vector<32x128xf32> -> vector<32x128xf32>
    %101 = arith.addf %97, %100 : vector<32x128xf32>
    %c3_60 = arith.constant 3 : index
    %c0_61 = arith.constant 0 : index
    %c0_62 = arith.constant 0 : index
    %102 = vector.load %arg3[%c3_60, %c0_61, %c0_62] : memref<4x32x1xf32, #tpu.memory_space<vmem>>, vector<1x32x1xf32>
    %103 = vector.shape_cast %102 : vector<1x32x1xf32> to vector<32x1xf32>
    %104 = vector.broadcast %103 : vector<32x1xf32> to vector<32x128xf32>
    %105 = arith.addf %101, %104 : vector<32x128xf32>
    %cst_63 = arith.constant 0.000000e+00 : f32
    %106 = vector.broadcast %cst_63 : f32 to vector<32x128xf32>
    %107 = arith.maximumf %105, %106 : vector<32x128xf32>
    %108 = arith.truncf %107 : vector<32x128xf32> to vector<32x128xbf16>
    %c0_64 = arith.constant 0 : index
    %c0_65 = arith.constant 0 : index
    %109 = vector.load %arg7[%c0_64, %c0_65] : memref<128x128xbf16, #tpu.memory_space<vmem>>, vector<128x128xbf16>
    %cst_66 = arith.constant dense<0.000000e+00> : vector<32x128xf32>
    %110 = tpu.matmul %108, %109, %cst_66 {dimension_numbers = #tpu.dot_dimension_numbers<[1], [0], [0], [1], [0, 0, 1, 1], [], []>} : vector<32x128xbf16>, vector<128x128xbf16>, vector<32x128xf32> -> vector<32x128xf32>
    %c0_67 = arith.constant 0 : index
    %c0_68 = arith.constant 0 : index
    %111 = vector.load %arg8[%c0_67, %c0_68] : memref<1x128xf32, #tpu.memory_space<vmem>>, vector<1x128xf32>
    %112 = vector.broadcast %111 : vector<1x128xf32> to vector<32x128xf32>
    %113 = arith.addf %110, %112 : vector<32x128xf32>
    %c0_69 = arith.constant 0 : index
    %c0_70 = arith.constant 0 : index
    %114 = vector.load %arg9[%c0_69, %c0_70] : memref<128x64xbf16, #tpu.memory_space<vmem>>, vector<128x64xbf16>
    %cst_71 = arith.constant dense<0.000000e+00> : vector<32x64xf32>
    %115 = tpu.matmul %108, %114, %cst_71 {dimension_numbers = #tpu.dot_dimension_numbers<[1], [0], [0], [1], [0, 0, 1, 1], [], []>} : vector<32x128xbf16>, vector<128x64xbf16>, vector<32x64xf32> -> vector<32x64xf32>
    %c0_72 = arith.constant 0 : index
    %c0_73 = arith.constant 0 : index
    %116 = vector.load %arg10[%c0_72, %c0_73] : memref<1x64xf32, #tpu.memory_space<vmem>>, vector<1x64xf32>
    %117 = vector.broadcast %116 : vector<1x64xf32> to vector<32x64xf32>
    %118 = arith.addf %115, %117 : vector<32x64xf32>
    %119 = vector.extract_strided_slice %113 {offsets = [0, 0], sizes = [32, 16], strides = [1, 1]} : vector<32x128xf32> to vector<32x16xf32>
    %c0_74 = arith.constant 0 : index
    %c0_75 = arith.constant 0 : index
    %c0_76 = arith.constant 0 : index
    %120 = vector.load %arg14[%c0_74, %c0_75, %c0_76] : memref<8x32x16xf32, #tpu.memory_space<vmem>>, vector<1x32x16xf32>
    %121 = vector.shape_cast %120 : vector<1x32x16xf32> to vector<32x16xf32>
    %122 = vector.shape_cast %119 : vector<32x16xf32> to vector<1x32x16xf32>
    tpu.vector_store %arg14[%c0_74, %c0_75, %c0_76], %122 {strides = array<i32>} : memref<8x32x16xf32, #tpu.memory_space<vmem>>, vector<1x32x16xf32>,
    %123 = vector.extract_strided_slice %113 {offsets = [0, 16], sizes = [32, 16], strides = [1, 1]} : vector<32x128xf32> to vector<32x16xf32>
    %c1_77 = arith.constant 1 : index
    %c0_78 = arith.constant 0 : index
    %c0_79 = arith.constant 0 : index
    %124 = vector.load %arg14[%c1_77, %c0_78, %c0_79] : memref<8x32x16xf32, #tpu.memory_space<vmem>>, vector<1x32x16xf32>
    %125 = vector.shape_cast %124 : vector<1x32x16xf32> to vector<32x16xf32>
    %126 = vector.shape_cast %123 : vector<32x16xf32> to vector<1x32x16xf32>
    tpu.vector_store %arg14[%c1_77, %c0_78, %c0_79], %126 {strides = array<i32>} : memref<8x32x16xf32, #tpu.memory_space<vmem>>, vector<1x32x16xf32>,
    %127 = vector.extract_strided_slice %113 {offsets = [0, 32], sizes = [32, 16], strides = [1, 1]} : vector<32x128xf32> to vector<32x16xf32>
    %c2_80 = arith.constant 2 : index
    %c0_81 = arith.constant 0 : index
    %c0_82 = arith.constant 0 : index
    %128 = vector.load %arg14[%c2_80, %c0_81, %c0_82] : memref<8x32x16xf32, #tpu.memory_space<vmem>>, vector<1x32x16xf32>
    %129 = vector.shape_cast %128 : vector<1x32x16xf32> to vector<32x16xf32>
    %130 = vector.shape_cast %127 : vector<32x16xf32> to vector<1x32x16xf32>
    tpu.vector_store %arg14[%c2_80, %c0_81, %c0_82], %130 {strides = array<i32>} : memref<8x32x16xf32, #tpu.memory_space<vmem>>, vector<1x32x16xf32>,
    %131 = vector.extract_strided_slice %113 {offsets = [0, 48], sizes = [32, 16], strides = [1, 1]} : vector<32x128xf32> to vector<32x16xf32>
    %c3_83 = arith.constant 3 : index
    %c0_84 = arith.constant 0 : index
    %c0_85 = arith.constant 0 : index
    %132 = vector.load %arg14[%c3_83, %c0_84, %c0_85] : memref<8x32x16xf32, #tpu.memory_space<vmem>>, vector<1x32x16xf32>
    %133 = vector.shape_cast %132 : vector<1x32x16xf32> to vector<32x16xf32>
    %134 = vector.shape_cast %131 : vector<32x16xf32> to vector<1x32x16xf32>
    tpu.vector_store %arg14[%c3_83, %c0_84, %c0_85], %134 {strides = array<i32>} : memref<8x32x16xf32, #tpu.memory_space<vmem>>, vector<1x32x16xf32>,
    %135 = vector.extract_strided_slice %113 {offsets = [0, 64], sizes = [32, 16], strides = [1, 1]} : vector<32x128xf32> to vector<32x16xf32>
    %c4_86 = arith.constant 4 : index
    %c0_87 = arith.constant 0 : index
    %c0_88 = arith.constant 0 : index
    %136 = vector.load %arg14[%c4_86, %c0_87, %c0_88] : memref<8x32x16xf32, #tpu.memory_space<vmem>>, vector<1x32x16xf32>
    %137 = vector.shape_cast %136 : vector<1x32x16xf32> to vector<32x16xf32>
    %138 = vector.shape_cast %135 : vector<32x16xf32> to vector<1x32x16xf32>
    tpu.vector_store %arg14[%c4_86, %c0_87, %c0_88], %138 {strides = array<i32>} : memref<8x32x16xf32, #tpu.memory_space<vmem>>, vector<1x32x16xf32>,
    %139 = vector.extract_strided_slice %113 {offsets = [0, 80], sizes = [32, 16], strides = [1, 1]} : vector<32x128xf32> to vector<32x16xf32>
    %c5_89 = arith.constant 5 : index
    %c0_90 = arith.constant 0 : index
    %c0_91 = arith.constant 0 : index
    %140 = vector.load %arg14[%c5_89, %c0_90, %c0_91] : memref<8x32x16xf32, #tpu.memory_space<vmem>>, vector<1x32x16xf32>
    %141 = vector.shape_cast %140 : vector<1x32x16xf32> to vector<32x16xf32>
    %142 = vector.shape_cast %139 : vector<32x16xf32> to vector<1x32x16xf32>
    tpu.vector_store %arg14[%c5_89, %c0_90, %c0_91], %142 {strides = array<i32>} : memref<8x32x16xf32, #tpu.memory_space<vmem>>, vector<1x32x16xf32>,
    %143 = vector.extract_strided_slice %113 {offsets = [0, 96], sizes = [32, 16], strides = [1, 1]} : vector<32x128xf32> to vector<32x16xf32>
    %c6_92 = arith.constant 6 : index
    %c0_93 = arith.constant 0 : index
    %c0_94 = arith.constant 0 : index
    %144 = vector.load %arg14[%c6_92, %c0_93, %c0_94] : memref<8x32x16xf32, #tpu.memory_space<vmem>>, vector<1x32x16xf32>
    %145 = vector.shape_cast %144 : vector<1x32x16xf32> to vector<32x16xf32>
    %146 = vector.shape_cast %143 : vector<32x16xf32> to vector<1x32x16xf32>
    tpu.vector_store %arg14[%c6_92, %c0_93, %c0_94], %146 {strides = array<i32>} : memref<8x32x16xf32, #tpu.memory_space<vmem>>, vector<1x32x16xf32>,
    %147 = vector.extract_strided_slice %113 {offsets = [0, 112], sizes = [32, 16], strides = [1, 1]} : vector<32x128xf32> to vector<32x16xf32>
    %c7_95 = arith.constant 7 : index
    %c0_96 = arith.constant 0 : index
    %c0_97 = arith.constant 0 : index
    %148 = vector.load %arg14[%c7_95, %c0_96, %c0_97] : memref<8x32x16xf32, #tpu.memory_space<vmem>>, vector<1x32x16xf32>
    %149 = vector.shape_cast %148 : vector<1x32x16xf32> to vector<32x16xf32>
    %150 = vector.shape_cast %147 : vector<32x16xf32> to vector<1x32x16xf32>
    tpu.vector_store %arg14[%c7_95, %c0_96, %c0_97], %150 {strides = array<i32>} : memref<8x32x16xf32, #tpu.memory_space<vmem>>, vector<1x32x16xf32>,
    %c63_i32 = arith.constant 63 : i32
    %151 = tpu.dynamic_rotate %118 by %c63_i32 dim 1 : vector<32x64xf32>, i32 -> vector<32x64xf32>
    %c0_98 = arith.constant 0 : index
    %c0_99 = arith.constant 0 : index
    %c0_100 = arith.constant 0 : index
    %152 = vector.load %arg6[%c0_98, %c0_99, %c0_100] : memref<3x1x64xf32, #tpu.memory_space<vmem>>, vector<1x1x64xf32>
    %153 = vector.shape_cast %152 : vector<1x1x64xf32> to vector<1x64xf32>
    %cst_101 = arith.constant 5.000000e-01 : f32
    %154 = vector.broadcast %cst_101 : f32 to vector<1x64xf32>
    %155 = arith.cmpf ogt, %153, %154 : vector<1x64xf32>
    %156 = arith.maximumf %118, %151 : vector<32x64xf32>
    %157 = vector.shape_cast %155 : vector<1x64xi1> to vector<1x64xi1>
    %158 = vector.broadcast %157 : vector<1x64xi1> to vector<32x64xi1>
    %159 = arith.select %158, %156, %118 : vector<32x64xi1>, vector<32x64xf32>
    %c62_i32 = arith.constant 62 : i32
    %160 = tpu.dynamic_rotate %159 by %c62_i32 dim 1 : vector<32x64xf32>, i32 -> vector<32x64xf32>
    %c1_102 = arith.constant 1 : index
    %c0_103 = arith.constant 0 : index
    %c0_104 = arith.constant 0 : index
    %161 = vector.load %arg6[%c1_102, %c0_103, %c0_104] : memref<3x1x64xf32, #tpu.memory_space<vmem>>, vector<1x1x64xf32>
    %162 = vector.shape_cast %161 : vector<1x1x64xf32> to vector<1x64xf32>
    %cst_105 = arith.constant 5.000000e-01 : f32
    %163 = vector.broadcast %cst_105 : f32 to vector<1x64xf32>
    %164 = arith.cmpf ogt, %162, %163 : vector<1x64xf32>
    %165 = arith.maximumf %159, %160 : vector<32x64xf32>
    %166 = vector.shape_cast %164 : vector<1x64xi1> to vector<1x64xi1>
    %167 = vector.broadcast %166 : vector<1x64xi1> to vector<32x64xi1>
    %168 = arith.select %167, %165, %159 : vector<32x64xi1>, vector<32x64xf32>
    %c60_i32 = arith.constant 60 : i32
    %169 = tpu.dynamic_rotate %168 by %c60_i32 dim 1 : vector<32x64xf32>, i32 -> vector<32x64xf32>
    %c2_106 = arith.constant 2 : index
    %c0_107 = arith.constant 0 : index
    %c0_108 = arith.constant 0 : index
    %170 = vector.load %arg6[%c2_106, %c0_107, %c0_108] : memref<3x1x64xf32, #tpu.memory_space<vmem>>, vector<1x1x64xf32>
    %171 = vector.shape_cast %170 : vector<1x1x64xf32> to vector<1x64xf32>
    %cst_109 = arith.constant 5.000000e-01 : f32
    %172 = vector.broadcast %cst_109 : f32 to vector<1x64xf32>
    %173 = arith.cmpf ogt, %171, %172 : vector<1x64xf32>
    %174 = arith.maximumf %168, %169 : vector<32x64xf32>
    %175 = vector.shape_cast %173 : vector<1x64xi1> to vector<1x64xi1>
    %176 = vector.broadcast %175 : vector<1x64xi1> to vector<32x64xi1>
    %177 = arith.select %176, %174, %168 : vector<32x64xi1>, vector<32x64xf32>
    %178 = arith.truncf %177 : vector<32x64xf32> to vector<32x64xbf16>
    %c0_110 = arith.constant 0 : index
    %c0_111 = arith.constant 0 : index
    %179 = vector.load %arg13[%c0_110, %c0_111] : memref<64x8xbf16, #tpu.memory_space<vmem>>, vector<64x8xbf16>
    %cst_112 = arith.constant dense<0.000000e+00> : vector<32x8xf32>
    %180 = tpu.matmul %178, %179, %cst_112 {dimension_numbers = #tpu.dot_dimension_numbers<[1], [0], [0], [1], [0, 0, 1, 1], [], []>} : vector<32x64xbf16>, vector<64x8xbf16>, vector<32x8xf32> -> vector<32x8xf32>
    %c0_113 = arith.constant 0 : index
    %c0_114 = arith.constant 0 : index
    %181 = vector.load %arg11[%c0_113, %c0_114] : memref<8x32xbf16, #tpu.memory_space<vmem>>, vector<8x32xbf16>
    %182 = arith.truncf %180 : vector<32x8xf32> to vector<32x8xbf16>
    %cst_115 = arith.constant dense<0.000000e+00> : vector<8x8xf32>
    %183 = tpu.matmul %181, %182, %cst_115 {dimension_numbers = #tpu.dot_dimension_numbers<[1], [0], [0], [1], [0, 0, 1, 1], [], []>} : vector<8x32xbf16>, vector<32x8xbf16>, vector<8x8xf32> -> vector<8x8xf32>
    %c0_116 = arith.constant 0 : index
    %c0_117 = arith.constant 0 : index
    %184 = vector.load %arg12[%c0_116, %c0_117] : memref<8x1xf32, #tpu.memory_space<vmem>>, vector<8x1xf32>
    %185 = vector.broadcast %184 : vector<8x1xf32> to vector<8x8xf32>
    %186 = arith.addf %183, %185 : vector<8x8xf32>
    %c0_118 = arith.constant 0 : index
    %c0_119 = arith.constant 0 : index
    %c0_120 = arith.constant 0 : index
    %187 = vector.load %arg15[%c0_118, %c0_119, %c0_120] : memref<1x8x8xf32, #tpu.memory_space<vmem>>, vector<1x8x8xf32>
    %188 = vector.shape_cast %187 : vector<1x8x8xf32> to vector<8x8xf32>
    %189 = vector.shape_cast %186 : vector<8x8xf32> to vector<1x8x8xf32>
    tpu.vector_store %arg15[%c0_118, %c0_119, %c0_120], %189 {strides = array<i32>} : memref<1x8x8xf32, #tpu.memory_space<vmem>>, vector<1x8x8xf32>,
    return
  }
  func.func @transform_0(%arg0: i32) -> (i32, i32, i32) {
    %c0_i32 = arith.constant 0 : i32
    %c0_i32_0 = arith.constant 0 : i32
    %c0_i32_1 = arith.constant 0 : i32
    return %arg0, %c0_i32, %c0_i32_0 : i32, i32, i32
  }
  func.func @transform_1(%arg0: i32) -> (i32, i32, i32) {
    %c0_i32 = arith.constant 0 : i32
    %c0_i32_0 = arith.constant 0 : i32
    %c0_i32_1 = arith.constant 0 : i32
    %c0_i32_2 = arith.constant 0 : i32
    return %c0_i32, %c0_i32_0, %c0_i32_1 : i32, i32, i32
  }
  func.func @transform_2(%arg0: i32) -> (i32, i32, i32) {
    %c0_i32 = arith.constant 0 : i32
    %c0_i32_0 = arith.constant 0 : i32
    %c0_i32_1 = arith.constant 0 : i32
    %c0_i32_2 = arith.constant 0 : i32
    return %c0_i32, %c0_i32_0, %c0_i32_1 : i32, i32, i32
  }
  func.func @transform_3(%arg0: i32) -> (i32, i32) {
    %c0_i32 = arith.constant 0 : i32
    %c0_i32_0 = arith.constant 0 : i32
    %c0_i32_1 = arith.constant 0 : i32
    return %c0_i32, %c0_i32_0 : i32, i32
  }
  func.func @transform_4(%arg0: i32) -> (i32, i32) {
    %c0_i32 = arith.constant 0 : i32
    %c0_i32_0 = arith.constant 0 : i32
    %c0_i32_1 = arith.constant 0 : i32
    return %c0_i32, %c0_i32_0 : i32, i32
  }
  func.func @transform_5(%arg0: i32) -> (i32, i32, i32) {
    %c0_i32 = arith.constant 0 : i32
    %c0_i32_0 = arith.constant 0 : i32
    %c0_i32_1 = arith.constant 0 : i32
    %c0_i32_2 = arith.constant 0 : i32
    return %c0_i32, %c0_i32_0, %c0_i32_1 : i32, i32, i32
  }
  func.func @transform_6(%arg0: i32) -> (i32, i32) {
    %c0_i32 = arith.constant 0 : i32
    %c0_i32_0 = arith.constant 0 : i32
    %c0_i32_1 = arith.constant 0 : i32
    return %c0_i32, %c0_i32_0 : i32, i32
  }
  func.func @transform_7(%arg0: i32) -> (i32, i32) {
    %c0_i32 = arith.constant 0 : i32
    %c0_i32_0 = arith.constant 0 : i32
    %c0_i32_1 = arith.constant 0 : i32
    return %c0_i32, %c0_i32_0 : i32, i32
  }
  func.func @transform_8(%arg0: i32) -> (i32, i32) {
    %c0_i32 = arith.constant 0 : i32
    %c0_i32_0 = arith.constant 0 : i32
    %c0_i32_1 = arith.constant 0 : i32
    return %c0_i32, %c0_i32_0 : i32, i32
  }
  func.func @transform_9(%arg0: i32) -> (i32, i32) {
    %c0_i32 = arith.constant 0 : i32
    %c0_i32_0 = arith.constant 0 : i32
    %c0_i32_1 = arith.constant 0 : i32
    return %c0_i32, %c0_i32_0 : i32, i32
  }
  func.func @transform_10(%arg0: i32) -> (i32, i32) {
    %c0_i32 = arith.constant 0 : i32
    %c0_i32_0 = arith.constant 0 : i32
    %c0_i32_1 = arith.constant 0 : i32
    return %c0_i32, %c0_i32_0 : i32, i32
  }
  func.func @transform_11(%arg0: i32) -> (i32, i32) {
    %c0_i32 = arith.constant 0 : i32
    %c0_i32_0 = arith.constant 0 : i32
    %c0_i32_1 = arith.constant 0 : i32
    return %c0_i32, %c0_i32_0 : i32, i32
  }
  func.func @transform_12(%arg0: i32) -> (i32, i32) {
    %c0_i32 = arith.constant 0 : i32
    %c0_i32_0 = arith.constant 0 : i32
    %c0_i32_1 = arith.constant 0 : i32
    return %c0_i32, %c0_i32_0 : i32, i32
  }
  func.func @transform_13(%arg0: i32) -> (i32, i32, i32) {
    %c0_i32 = arith.constant 0 : i32
    %c0_i32_0 = arith.constant 0 : i32
    %c0_i32_1 = arith.constant 0 : i32
    return %arg0, %c0_i32, %c0_i32_0 : i32, i32, i32
  }
  func.func @transform_14(%arg0: i32) -> (i32, i32, i32) {
    %c0_i32 = arith.constant 0 : i32
    %c0_i32_0 = arith.constant 0 : i32
    %c0_i32_1 = arith.constant 0 : i32
    return %arg0, %c0_i32, %c0_i32_0 : i32, i32, i32
  }
}

</mosaic_0001>

<bundles_post_ra>
// kernel: tpu_custom_call.1
= control target key start
LH: loop header
LB: loop body
LE: loop exit
PB: predicated region body
PF: predicated region fallthrough
CT: control target
= control target key end

     0   :  { %20 = vsyncpa [#allocation3], 0  ;;  %s3372_s0 = inlined_call_operand.hbm [shape: f32[1,32,128], index: 0, kind: input, shape index: {}]   ;;  %s3373_s1 = inlined_call_operand.vmem [shape: bf16[12,32,32], index: 1, kind: input, shape index: {}]   ;;  %s3374_s2 = inlined_call_operand.vmem [shape: f32[4,32,1], index: 2, kind: input, shape index: {}]   ;;  %s3375_s3 = inlined_call_operand.hbm [shape: bf16[1,128], index: 3, kind: input, shape index: {}]   ;;  %s3376_s4 = inlined_call_operand.hbm [shape: bf16[1,128], index: 4, kind: input, shape index: {}]   ;;  %s3377_s5 = inlined_call_operand.vmem [shape: f32[3,1,64], index: 5, kind: input, shape index: {}]   ;;  %s3378_s6 = inlined_call_operand.vmem [shape: bf16[128,128], index: 6, kind: input, shape index: {}]   ;;  %s3379_s7 = inlined_call_operand.hbm [shape: f32[1,128], index: 7, kind: input, shape index: {}]   ;;  %s3380_s8 = inlined_call_operand.vmem [shape: bf16[128,64], index: 8, kind: input, shape index: {}]   ;;  %s3381_s9 = inlined_call_operand.vmem [shape: f32[1,64], index: 9, kind: input, shape index: {}]   ;;  %s3382_s10 = inlined_call_operand.vmem [shape: bf16[8,32], index: 10, kind: input, shape index: {}]   ;;  %s3383_s11 = inlined_call_operand.vmem [shape: f32[8,1], index: 11, kind: input, shape index: {}]   ;;  %s3384_s12 = inlined_call_operand.vmem [shape: bf16[64,8], index: 12, kind: input, shape index: {}]   ;;  %s3385_s13 = inlined_call_operand.vmem [shape: f32[8,32,16], index: 13, kind: output, shape index: {0}]   ;;  %s3386_s14 = inlined_call_operand.hbm [shape: f32[1,8,8], index: 14, kind: output, shape index: {1}]  }
   0x1   :  { %21 = vsyncpa [#allocation6], 0 }
   0x2   :  { %22 = vsyncpa [#allocation9], 0 }
   0x3   :  { %23 = vsyncpa [#allocation4], 0  ;;  %s2693_s29 = smov [#allocation5]   ;;  %s2694_s15 = smov [#allocation2]  }
   0x4   :  { %s46_s30 = sshll.u32 %s2693_s29, 4  ;;  %s29_s16 = sshll.u32 %s2694_s15, 4  ;;  %s47_s30 = int_to_ptr.vmem [resolvable:$true] %s46_s30  ;;  %s2789_s16 = int_to_ptr.vmem [resolvable:$true] %s29_s16 }
   0x5   :  { %s2575_s19 = scalar_lea.hbm %s3375_s3, 16 }
   0x6   :  { %p2576_p0 = scmp.ne.s32.totalorder %s3375_s3, %s2575_s19  ;;  %p2579_p1 = scmp.lt.u32.totalorder %s2575_s19, %s3375_s3 }
   0x8   :  { %p2581_p2 = pnand %p2579_p1, %p2576_p0 }
   0xa   :  { %2584 = shalt.err (!%p2581_p2)
}
   0xb   :  { %s2585_s24 = scalar_lea.vmem %s47_s30, 16  ;;  %s2589_s25 = scalar_lea.vmem %s47_s30, 32 }
   0xc   :  { %p2586_p3 = scmp.ne.s32.totalorder %s47_s30, %s2585_s24  ;;  %p2590_p4 = scmp.lt.s32.totalorder %s47_s30, %s47_s30 }
   0xd   :  { %p2591_p5 = scmp.lt.s32.totalorder %s2589_s25, %s2585_s24 }
   0xf   :  { %p2592_p6 = por %p2591_p5, %p2590_p4 }
  0x11   :  { %p2593_p7 = pnand %p2592_p6, %p2586_p3 }
  0x13   :  { %2596 = shalt.err (!%p2593_p7)
}
  0x14   :  { %49 = dma.hbm_to_vmem [thread:$0]  %s3375_s3, 16, %s47_s30, [#allocation6]  }
  0x15   :  { %s2597_s15 = scalar_lea.hbm %s3372_s0, 512 }
  0x16   :  { %p2598_p8 = scmp.ne.s32.totalorder %s3372_s0, %s2597_s15  ;;  %p2601_p9 = scmp.lt.u32.totalorder %s2597_s15, %s3372_s0 }
  0x18   :  { %p2603_p10 = pnand %p2601_p9, %p2598_p8 }
  0x1a   :  { %2606 = shalt.err (!%p2603_p10)
}
  0x1b   :  { %s2607_s21 = scalar_lea.vmem %s2789_s16, 512  ;;  %p2612_p12 = scmp.lt.s32.totalorder %s2789_s16, %s2789_s16 }
  0x1c   :  { %p2608_p11 = scmp.ne.s32.totalorder %s2789_s16, %s2607_s21  ;;  %p2613_p13 = scmp.lt.s32.totalorder %s2607_s21, %s2607_s21 }
  0x1e   :  { %p2614_p0 = por %p2613_p13, %p2612_p12 }
  0x20   :  { %p2615_p1 = pnand %p2614_p0, %p2608_p11 }
  0x22   :  { %2618 = shalt.err (!%p2615_p1)
}
  0x23   :  { %s2695_s3 = smov 128   ;;  %s2696_s30 = smov 8  }
  0x24   :  { %35 = dma.hbm_to_vmem [thread:$0]  %s3372_s0, 512, %s2789_s16, [#allocation3], %s2695_s3, %s2695_s3, %s2696_s30  }
  0x25   :  { %s2697_s24 = smov [#allocation7]   ;;  %s2698_s26 = smov [#allocation8]  }
  0x26   :  { %s56_s25 = sshll.u32 %s2697_s24, 4  ;;  %s70_s27 = sshll.u32 %s2698_s26, 4  ;;  %s57_s25 = int_to_ptr.vmem [resolvable:$true] %s56_s25  ;;  %s71_s27 = int_to_ptr.vmem [resolvable:$true] %s70_s27 }
  0x27   :  { %s2619_s15 = scalar_lea.hbm %s3376_s4, 16 }
  0x28   :  { %p2620_p2 = scmp.ne.s32.totalorder %s3376_s4, %s2619_s15  ;;  %p2623_p3 = scmp.lt.u32.totalorder %s2619_s15, %s3376_s4 }
  0x2a   :  { %p2625_p4 = pnand %p2623_p3, %p2620_p2 }
  0x2c   :  { %2628 = shalt.err (!%p2625_p4)
}
  0x2d   :  { %s2629_s0 = scalar_lea.vmem %s57_s25, 16  ;;  %s2633_s16 = scalar_lea.vmem %s57_s25, 32 }
  0x2e   :  { %p2630_p5 = scmp.ne.s32.totalorder %s57_s25, %s2629_s0  ;;  %p2634_p6 = scmp.lt.s32.totalorder %s57_s25, %s57_s25 }
  0x2f   :  { %p2635_p7 = scmp.lt.s32.totalorder %s2633_s16, %s2629_s0 }
  0x31   :  { %p2636_p8 = por %p2635_p7, %p2634_p6 }
  0x33   :  { %p2637_p9 = pnand %p2636_p8, %p2630_p5 }
  0x35   :  { %2640 = shalt.err (!%p2637_p9)
}
  0x36   :  { %59 = dma.hbm_to_vmem [thread:$0]  %s3376_s4, 16, %s57_s25, [#allocation6]  }
  0x37   :  { %s2641_s23 = scalar_lea.hbm %s3379_s7, 16 }
  0x38   :  { %p2642_p10 = scmp.ne.s32.totalorder %s3379_s7, %s2641_s23  ;;  %p2645_p11 = scmp.lt.u32.totalorder %s2641_s23, %s3379_s7 }
  0x3a   :  { %p2647_p12 = pnand %p2645_p11, %p2642_p10 }
  0x3c   :  { %2650 = shalt.err (!%p2647_p12)
}
  0x3d   :  { %s2651_s15 = scalar_lea.vmem %s71_s27, 16  ;;  %s2655_s17 = scalar_lea.vmem %s71_s27, 32 }
  0x3e   :  { %p2652_p13 = scmp.ne.s32.totalorder %s71_s27, %s2651_s15  ;;  %p2656_p0 = scmp.lt.s32.totalorder %s71_s27, %s71_s27 }
  0x3f   :  { %p2657_p1 = scmp.lt.s32.totalorder %s2655_s17, %s2651_s15 }
  0x41   :  { %p2658_p2 = por %p2657_p1, %p2656_p0 }
  0x43   :  { %p2659_p3 = pnand %p2658_p2, %p2652_p13 }
  0x45   :  { %2662 = shalt.err (!%p2659_p3)
}
  0x46   :  { %73 = dma.hbm_to_vmem [thread:$0]  %s3379_s7, 16, %s71_s27, [#allocation9]  }
  0x47   :  { %2685 = dma.done.wait [#allocation3], 512  }
  0x48   :  { %2686 = vsyncadd [#allocation3], 4294966784 }
  0x49   :  { %2687 = dma.done.wait [#allocation6], 32  }
  0x4a   :  { %2688 = vsyncadd [#allocation6], 4294967264 }
  0x4b   :  { %2689 = dma.done.wait [#allocation9], 16  }
  0x4c   :  { %2690 = vsyncadd [#allocation9], 4294967280  ;;  %v99_v0 = vld [vmem:[#allocation2] sm:$0xff]  ;;  %v100_v1 = vld [vmem:[#allocation2 + $0x8] sm:$0xff]  ;;  %vm162_vm0 = vcmask 261120   ;;  %s2699_s20 = smov 1   ;;  %v118_v14 = vlaneseq }
  0x4d   :  { %v101_v2 = vld [vmem:[#allocation2 + $0x10] sm:$0xff]  ;;  %v2359_v3 = vpack.i.bf16 %v100_v1, %v99_v0  ;;  %v102_v4 = vld [vmem:[#allocation2 + $0x18] sm:$0xff]  ;;  %v2531_v5 = vld [vmem:[%s3373_s1] sm:$0xff]   ;;  %s2700_s7 = smov 127   ;;  %v103_v7 = vpack.c.bf16 %v100_v1, %v99_v0  ;;  %v2701_v10 = vmov 0   ;;  %vm1450_vm1 = vcmask 130048  }
  0x4e   :  { %v2364_v6 = vpack.i.bf16 %v102_v4, %v101_v2  ;;  %2154 = vmatprep.mubr.msk.bf16.mxu0 %vm162_vm0, %v2531_v5  ;;  %v104_v8 = vpack.c.bf16 %v102_v4, %v101_v2  ;;  %v358_v9 = vld [vmem:[%s3374_s2 + $0x8] sm:$0xff]  ;;  %2380 = vset.pattern.permute.xlu1 %v2701_v10  ;;  %v357_v11 = vld [vmem:[%s3374_s2] sm:$0xff]  ;;  %v359_v12 = vld [vmem:[%s3374_s2 + $0x10] sm:$0xff]  ;;  %v119_v15 = vshrl.u32 %v118_v14, 7  ;;  %s2702_s16 = smov 64   ;;  %vm1578_vm2 = vcmask 1048064  }
  0x4f   :  { %2360 = vrot.lane.b32.xlu0 %v2359_v3, %s2699_s20  ;;  %2370 = vrot.lane.b32.xlu1 %v2359_v3, %s2700_s7  ;;  %v360_v13 = vld [vmem:[%s3374_s2 + $0x18] sm:$0xff]  ;;  %v97_v16 = vld [vmem:[#allocation5] sm:$0x1]  ;;  %v98_v29 = vld [vmem:[#allocation7] sm:$0x1]  ;;  %s2706_s4 = smov 96  }
  0x50   :  { %2379 = vset.pattern.permute.xlu0 %v2701_v10  ;;  %v116_v17 = vpack.i.b16 %v97_v16, %v97_v16  ;;  %v2866_v18 = vsub.s32 0, %v119_v15  ;;  %v135_v34 = vpack.i.b16 %v98_v29, %v98_v29  ;;  %v2532_v35 = vld [vmem:[%s3373_s1 + $0x8] sm:$0xff]   ;;  %v2533_v36 = vld [vmem:[%s3373_s1 + $0x10] sm:$0xff]   ;;  %v2534_v44 = vld [vmem:[%s3373_s1 + $0x18] sm:$0xff]   ;;  %s2707_s25 = smov 80   ;;  %s2710_s18 = smov 16  }
  0x51   :  { %v2535_v45 = vld [vmem:[%s3373_s1 + $0x20] sm:$0xff]   ;;  %v2536_v47 = vld [vmem:[%s3373_s1 + $0x28] sm:$0xff]   ;;  %v2537_v4 = vld [vmem:[%s3373_s1 + $0x30] sm:$0xff]   ;;  %vm1783_vm9 = vcmask 523264   ;;  %vm2712_vm10 = vmmov 0   ;;  %vm1891_vm11 = vcmask 64512  }
  0x52   :  { %v2869_v22 = vrot.slane %v116_v17, %v2866_v18  ;;  %v2880_v38 = vrot.slane %v135_v34, %v2866_v18  ;;  %2178 = vmatprep.mubr.msk.bf16.mxu1 %vm162_vm0, %v2537_v4  ;;  %v1959_v5 = vld [vmem:[%s3374_s2 + $0x28] sm:$0xff]  ;;  %v2541_v34 = vld [vmem:[%s3373_s1 + $0x50] sm:$0xff]  }
  0x53   :  { %2365 = vrot.lane.b32.xlu0 %v2364_v6, %s2699_s20  ;;  %2375 = vrot.lane.b32.xlu1 %v2364_v6, %s2700_s7  ;;  %v1958_v6 = vld [vmem:[%s3374_s2 + $0x20] sm:$0xff] }
  0x57   :  { %368 = vperm.xlu1 %2380, %v358_v9   ;;  %363 = vperm.xlu0 %2379, %v357_v11  }
  0x5b   :  { %373 = vperm.xlu1 %2380, %v359_v12   ;;  %378 = vperm.xlu0 %2379, %v360_v13  }
  0xc1   :  { %v2361_v19 = vpop.permute.xlu0 %2360  ;;  %v2371_v28 = vpop.permute.xlu1 %2370 }
  0xc2   :  { %v2363_v20 = vunpack.i.h.bf16 %v2361_v19  ;;  %v2362_v21 = vunpack.i.l.bf16 %v2361_v19  ;;  %v2373_v32 = vunpack.i.h.bf16 %v2371_v28  ;;  %v2372_v33 = vunpack.i.l.bf16 %v2371_v28 }
  0xc4   :  { %v113_v23 = vpack.c.bf16 %v2363_v20, %v2362_v21  ;;  %v132_v37 = vpack.c.bf16 %v2373_v32, %v2372_v33  ;;  %v2540_v33 = vld [vmem:[%s3373_s1 + $0x48] sm:$0xff]  }
  0xc5   :  { %v2366_v24 = vpop.permute.xlu0 %2365  ;;  %v2376_v39 = vpop.permute.xlu1 %2375 }
  0xc6   :  { %v2368_v25 = vunpack.i.h.bf16 %v2366_v24  ;;  %v2367_v26 = vunpack.i.l.bf16 %v2366_v24  ;;  %v122_v27 = vmul.bf16 %v2869_v22, %v113_v23  ;;  %v2378_v40 = vunpack.i.h.bf16 %v2376_v39 }
  0xc7   :  { %v2377_v41 = vunpack.i.l.bf16 %v2376_v39  ;;  %v141_v42 = vmul.bf16 %v2880_v38, %v132_v37 }
  0xc8   :  { %v114_v30 = vpack.c.bf16 %v2368_v25, %v2367_v26  ;;  %2150 = vmatprep.subr.bf16.mxu0 %v122_v27  ;;  %v2538_v25 = vld [vmem:[%s3373_s1 + $0x38] sm:$0xff]   ;;  %v2539_v26 = vld [vmem:[%s3373_s1 + $0x40] sm:$0xff]  }
  0xc9   :  { %2151 = vmatpush3.bf16.msra.mxu0 %v122_v27  ;;  %v133_v43 = vpack.c.bf16 %v2378_v40, %v2377_v41 }
  0xca   :  { %v123_v31 = vmul.bf16 %v2869_v22, %v114_v30 }
  0xcb   :  { %v142_v46 = vmul.bf16 %v2880_v38, %v133_v43 }
  0xcc   :  { %2152 = vmatprep.subr.bf16.mxu0 %v123_v31 }
  0xcd   :  { %2153 = vmatpush3.bf16.msra.mxu0 %v123_v31 }
  0xce   :  { %2158 = vmatprep.subr.bf16.mxu0 %v103_v7 }
  0xd0   :  { %2155 = vmatmul.mubr.msk.bf16.vlgmr.msra.gmra.mrb[0].mxu0 %vm162_vm0, %v2532_v35 }
  0xd1   :  { %2159 = vmatpush3.bf16.msra.mxu0 %v103_v7  ;;  %2162 = vmatprep.mubr.msk.bf16.mxu0 %vm162_vm0, %v2533_v36  ;;  %v1961_v7 = vld [vmem:[%s3374_s2 + $0x38] sm:$0xff] }
  0xd2   :  { %2160 = vmatprep.subr.bf16.mxu0 %v104_v8  ;;  %v2542_v36 = vld [vmem:[%s3373_s1 + $0x58] sm:$0xff]  }
  0xd5   :  { %2161 = vmatpush3.bf16.msra.mxu0 %v104_v8  ;;  %v1960_v8 = vld [vmem:[%s3374_s2 + $0x30] sm:$0xff] }
  0xd6   :  { %2166 = vmatprep.subr.bf16.mxu0 %v141_v42  ;;  %v369_v48 = vpop.permute.xlu1 %368  ;;  %v364_v49 = vpop.permute.xlu0 %363 }
  0xda   :  { %v374_v50 = vpop.permute.xlu1 %373  ;;  %v379_v52 = vpop.permute.xlu0 %378 }
  0xdc   :  { %2163 = vmatmul.mubr.msk.bf16.vlgmr.msra.gmra.mrb[0].mxu0 %vm162_vm0, %v2534_v44 }
  0xdd   :  { %2167 = vmatpush3.bf16.msra.mxu0 %v141_v42  ;;  %2170 = vmatprep.mubr.msk.bf16.mxu0 %vm162_vm0, %v2535_v45 }
  0xde   :  { %2168 = vmatprep.subr.bf16.mxu0 %v142_v46 }
  0xe1   :  { %2169 = vmatpush3.bf16.msra.mxu0 %v142_v46 }
  0xe8   :  { %2171 = vmatmul.mubr.msk.bf16.vlgmr.msra.gmra.mrb[0].mxu0 %vm162_vm0, %v2536_v47 }
 0x1bb   :  { %v2172_v51 = vpop.f32.mrb[0].mxu0 }
 0x1bc   :  { %v383_v53 = vadd.f32 %v2172_v51, %v374_v50  ;;  %v338_v54 = vpop.f32.mrb[1].mxu0 }
 0x1bd   :  { %v381_v55 = vadd.f32 %v364_v49, %v338_v54  ;;  %v2173_v56 = vpop.f32.mrb[2].mxu0 }
 0x1be   :  { %v384_v57 = vadd.f32 %v2173_v56, %v379_v52  ;;  %v341_v58 = vpop.f32.mrb[3].mxu0  ;;  %v387_v60 = vmax.f32 %v383_v53, 0.0 }
 0x1bf   :  { %v382_v59 = vadd.f32 %v369_v48, %v341_v58  ;;  %v385_v62 = vmax.f32 %v381_v55, 0.0  ;;  %v2543_v58 = vld [vmem:[%s3373_s1 + $0x60] sm:$0xff]  }
 0x1c0   :  { %v388_v61 = vmax.f32 %v384_v57, 0.0  ;;  %2202 = vmatprep.mubr.msk.bf16.mxu0 %vm162_vm0, %v2543_v58  ;;  %v2565_v58 = vld [vmem:[%s3378_s6 + $0x28] sm:$0xff]  }
 0x1c1   :  { %v386_v63 = vmax.f32 %v382_v59, 0.0  ;;  %v1987_v59 = vld [vmem:[%s3374_s2 + $0x48] sm:$0xff] }
 0x1c2   :  { %v2386_v0 = vpack.i.bf16 %v388_v61, %v387_v60  ;;  %v390_v1 = vpack.c.bf16 %v388_v61, %v387_v60  ;;  %v1986_v60 = vld [vmem:[%s3374_s2 + $0x40] sm:$0xff]  ;;  %v1989_v61 = vld [vmem:[%s3374_s2 + $0x58] sm:$0xff] }
 0x1c3   :  { %v2381_v2 = vpack.i.bf16 %v386_v63, %v385_v62  ;;  %v389_v3 = vpack.c.bf16 %v386_v63, %v385_v62  ;;  %v1988_v62 = vld [vmem:[%s3374_s2 + $0x50] sm:$0xff] }
 0x1c4   :  { %2387 = vrot.lane.b32.xlu0 %v2386_v0, %s2699_s20 }
 0x1c5   :  { %2382 = vrot.lane.b32.xlu1 %v2381_v2, %s2699_s20 }
 0x1c8   :  { %2397 = vrot.lane.b32.xlu0 %v2386_v0, %s2700_s7 }
 0x1c9   :  { %2392 = vrot.lane.b32.xlu1 %v2381_v2, %s2700_s7 }
 0x1cc   :  { %641 = vperm.xlu0 %2379, %v1959_v5  }
 0x1cd   :  { %636 = vperm.xlu1 %2380, %v1958_v6  }
 0x1d0   :  { %651 = vperm.xlu0 %2379, %v1961_v7  }
 0x1d1   :  { %646 = vperm.xlu1 %2380, %v1960_v8  }
 0x236   :  { %v2388_v9 = vpop.permute.xlu0 %2387 }
 0x237   :  { %v2390_v11 = vunpack.i.h.bf16 %v2388_v9  ;;  %v2389_v12 = vunpack.i.l.bf16 %v2388_v9  ;;  %v2383_v13 = vpop.permute.xlu1 %2382 }
 0x238   :  { %v2385_v14 = vunpack.i.h.bf16 %v2383_v13  ;;  %v2384_v15 = vunpack.i.l.bf16 %v2383_v13  ;;  %v2544_v13 = vld [vmem:[%s3373_s1 + $0x68] sm:$0xff]  }
 0x239   :  { %v400_v16 = vpack.c.bf16 %v2390_v11, %v2389_v12 }
 0x23a   :  { %v399_v17 = vpack.c.bf16 %v2385_v14, %v2384_v15  ;;  %v2398_v28 = vpop.permute.xlu0 %2397  ;;  %v2545_v14 = vld [vmem:[%s3373_s1 + $0x70] sm:$0xff]  }
 0x23b   :  { %v402_v20 = vmul.bf16 %v400_v16, %v2869_v22  ;;  %v2393_v21 = vpop.permute.xlu1 %2392  ;;  %v2400_v29 = vunpack.i.h.bf16 %v2398_v28  ;;  %v2399_v30 = vunpack.i.l.bf16 %v2398_v28 }
 0x23c   :  { %v401_v19 = vmul.bf16 %v399_v17, %v2869_v22  ;;  %v2395_v23 = vunpack.i.h.bf16 %v2393_v21  ;;  %v2394_v24 = vunpack.i.l.bf16 %v2393_v21 }
 0x23d   :  { %v412_v32 = vpack.c.bf16 %v2400_v29, %v2399_v30 }
 0x23e   :  { %2174 = vmatprep.subr.bf16.mxu1 %v401_v19  ;;  %v411_v27 = vpack.c.bf16 %v2395_v23, %v2394_v24  ;;  %v2546_v23 = vld [vmem:[%s3373_s1 + $0x78] sm:$0xff]   ;;  %v2547_v24 = vld [vmem:[%s3373_s1 + $0x80] sm:$0xff]  }
 0x23f   :  { %2175 = vmatpush3.bf16.msra.mxu1 %v401_v19  ;;  %v414_v35 = vmul.bf16 %v412_v32, %v2880_v38 }
 0x240   :  { %2176 = vmatprep.subr.bf16.mxu1 %v402_v20  ;;  %v413_v31 = vmul.bf16 %v411_v27, %v2880_v38 }
 0x243   :  { %2177 = vmatpush3.bf16.msra.mxu1 %v402_v20 }
 0x244   :  { %2182 = vmatprep.subr.bf16.mxu1 %v389_v3 }
 0x246   :  { %2179 = vmatmul.mubr.msk.bf16.vlgmr.msra.gmra.mrb[0].mxu1 %vm162_vm0, %v2538_v25 }
 0x247   :  { %2183 = vmatpush3.bf16.msra.mxu1 %v389_v3  ;;  %2186 = vmatprep.mubr.msk.bf16.mxu1 %vm162_vm0, %v2539_v26  ;;  %v2548_v26 = vld [vmem:[%s3373_s1 + $0x88] sm:$0xff]  }
 0x248   :  { %2184 = vmatprep.subr.bf16.mxu1 %v390_v1 }
 0x24b   :  { %2185 = vmatpush3.bf16.msra.mxu1 %v390_v1  ;;  %v642_v39 = vpop.permute.xlu0 %641 }
 0x24c   :  { %2190 = vmatprep.subr.bf16.mxu1 %v413_v31  ;;  %v637_v37 = vpop.permute.xlu1 %636 }
 0x24f   :  { %v652_v44 = vpop.permute.xlu0 %651 }
 0x250   :  { %v647_v40 = vpop.permute.xlu1 %646 }
 0x252   :  { %2187 = vmatmul.mubr.msk.bf16.vlgmr.msra.gmra.mrb[0].mxu1 %vm162_vm0, %v2540_v33 }
 0x253   :  { %2191 = vmatpush3.bf16.msra.mxu1 %v413_v31  ;;  %2194 = vmatprep.mubr.msk.bf16.mxu1 %vm162_vm0, %v2541_v34 }
 0x254   :  { %2192 = vmatprep.subr.bf16.mxu1 %v414_v35 }
 0x257   :  { %2193 = vmatpush3.bf16.msra.mxu1 %v414_v35 }
 0x25e   :  { %2195 = vmatmul.mubr.msk.bf16.vlgmr.msra.gmra.mrb[0].mxu1 %vm162_vm0, %v2542_v36 }
 0x331   :  { %v2196_v41 = vpop.f32.mrb[0].mxu1 }
 0x332   :  { %v656_v42 = vadd.f32 %v2196_v41, %v647_v40  ;;  %v610_v43 = vpop.f32.mrb[1].mxu1 }
 0x333   :  { %v654_v45 = vadd.f32 %v637_v37, %v610_v43  ;;  %v2197_v46 = vpop.f32.mrb[2].mxu1 }
 0x334   :  { %v657_v47 = vadd.f32 %v2197_v46, %v652_v44  ;;  %v613_v48 = vpop.f32.mrb[3].mxu1  ;;  %v660_v50 = vmax.f32 %v656_v42, 0.0 }
 0x335   :  { %v655_v49 = vadd.f32 %v642_v39, %v613_v48  ;;  %v658_v52 = vmax.f32 %v654_v45, 0.0  ;;  %v2549_v48 = vld [vmem:[%s3373_s1 + $0x90] sm:$0xff]  }
 0x336   :  { %v661_v51 = vmax.f32 %v657_v47, 0.0  ;;  %2226 = vmatprep.mubr.msk.bf16.mxu1 %vm162_vm0, %v2549_v48 }
 0x337   :  { %v659_v53 = vmax.f32 %v655_v49, 0.0  ;;  %v2015_v49 = vld [vmem:[%s3374_s2 + $0x68] sm:$0xff] }
 0x338   :  { %v2406_v54 = vpack.i.bf16 %v661_v51, %v660_v50  ;;  %v663_v55 = vpack.c.bf16 %v661_v51, %v660_v50  ;;  %v2014_v50 = vld [vmem:[%s3374_s2 + $0x60] sm:$0xff]  ;;  %v2017_v51 = vld [vmem:[%s3374_s2 + $0x78] sm:$0xff] }
 0x339   :  { %v2401_v56 = vpack.i.bf16 %v659_v53, %v658_v52  ;;  %v662_v57 = vpack.c.bf16 %v659_v53, %v658_v52  ;;  %v2016_v52 = vld [vmem:[%s3374_s2 + $0x70] sm:$0xff]  ;;  %v2555_v53 = vld [vmem:[%s3378_s6] sm:$0xff]  }
 0x33a   :  { %2407 = vrot.lane.b32.xlu0 %v2406_v54, %s2699_s20 }
 0x33b   :  { %2402 = vrot.lane.b32.xlu1 %v2401_v56, %s2699_s20 }
 0x33e   :  { %2417 = vrot.lane.b32.xlu0 %v2406_v54, %s2700_s7  ;;  %v2557_v54 = vld [vmem:[%s3378_s6 + $0x8] sm:$0xff]  }
 0x33f   :  { %2412 = vrot.lane.b32.xlu1 %v2401_v56, %s2700_s7  ;;  %v2561_v56 = vld [vmem:[%s3378_s6 + $0x18] sm:$0xff]  }
 0x342   :  { %914 = vperm.xlu0 %2379, %v1987_v59  }
 0x343   :  { %909 = vperm.xlu1 %2380, %v1986_v60  }
 0x346   :  { %924 = vperm.xlu0 %2379, %v1989_v61  }
 0x347   :  { %919 = vperm.xlu1 %2380, %v1988_v62  }
 0x3ac   :  { %v2408_v63 = vpop.permute.xlu0 %2407 }
 0x3ad   :  { %v2410_v0 = vunpack.i.h.bf16 %v2408_v63  ;;  %v2409_v1 = vunpack.i.l.bf16 %v2408_v63  ;;  %v2403_v2 = vpop.permute.xlu1 %2402 }
 0x3ae   :  { %v2405_v3 = vunpack.i.h.bf16 %v2403_v2  ;;  %v2404_v4 = vunpack.i.l.bf16 %v2403_v2 }
 0x3af   :  { %v673_v5 = vpack.c.bf16 %v2410_v0, %v2409_v1 }
 0x3b0   :  { %v672_v6 = vpack.c.bf16 %v2405_v3, %v2404_v4  ;;  %v2418_v16 = vpop.permute.xlu0 %2417 }
 0x3b1   :  { %v675_v8 = vmul.bf16 %v673_v5, %v2869_v22  ;;  %v2413_v9 = vpop.permute.xlu1 %2412  ;;  %v2420_v17 = vunpack.i.h.bf16 %v2418_v16  ;;  %v2419_v19 = vunpack.i.l.bf16 %v2418_v16  ;;  %v2552_v16 = vld [vmem:[%s3373_s1 + $0xa8] sm:$0xff]  }
 0x3b2   :  { %v674_v7 = vmul.bf16 %v672_v6, %v2869_v22  ;;  %v2415_v11 = vunpack.i.h.bf16 %v2413_v9  ;;  %v2414_v12 = vunpack.i.l.bf16 %v2413_v9  ;;  %v2551_v9 = vld [vmem:[%s3373_s1 + $0xa0] sm:$0xff]  }
 0x3b3   :  { %v685_v21 = vpack.c.bf16 %v2420_v17, %v2419_v19  ;;  %v2553_v17 = vld [vmem:[%s3373_s1 + $0xb0] sm:$0xff]  }
 0x3b4   :  { %2198 = vmatprep.subr.bf16.mxu0 %v674_v7  ;;  %v684_v15 = vpack.c.bf16 %v2415_v11, %v2414_v12 }
 0x3b5   :  { %2199 = vmatpush3.bf16.msra.mxu0 %v674_v7  ;;  %v687_v25 = vmul.bf16 %v685_v21, %v2880_v38  ;;  %v2554_v21 = vld [vmem:[%s3373_s1 + $0xb8] sm:$0xff]  }
 0x3b6   :  { %2200 = vmatprep.subr.bf16.mxu0 %v675_v8  ;;  %v686_v20 = vmul.bf16 %v684_v15, %v2880_v38 }
 0x3b9   :  { %2201 = vmatpush3.bf16.msra.mxu0 %v675_v8  ;;  %v2550_v8 = vld [vmem:[%s3373_s1 + $0x98] sm:$0xff]  }
 0x3ba   :  { %2206 = vmatprep.subr.bf16.mxu0 %v662_v57 }
 0x3bc   :  { %2203 = vmatmul.mubr.msk.bf16.vlgmr.msra.gmra.mrb[4].mxu0 %vm162_vm0, %v2544_v13 }
 0x3bd   :  { %2207 = vmatpush3.bf16.msra.mxu0 %v662_v57  ;;  %2210 = vmatprep.mubr.msk.bf16.mxu0 %vm162_vm0, %v2545_v14  ;;  %v2563_v57 = vld [vmem:[%s3378_s6 + $0x20] sm:$0xff]  }
 0x3be   :  { %2208 = vmatprep.subr.bf16.mxu0 %v663_v55 }
 0x3c1   :  { %2209 = vmatpush3.bf16.msra.mxu0 %v663_v55  ;;  %v915_v28 = vpop.permute.xlu0 %914  ;;  %v2559_v55 = vld [vmem:[%s3378_s6 + $0x10] sm:$0xff]  }
 0x3c2   :  { %2214 = vmatprep.subr.bf16.mxu0 %v686_v20  ;;  %v910_v27 = vpop.permute.xlu1 %909 }
 0x3c5   :  { %v925_v33 = vpop.permute.xlu0 %924 }
 0x3c6   :  { %v920_v29 = vpop.permute.xlu1 %919 }
 0x3c8   :  { %2211 = vmatmul.mubr.msk.bf16.vlgmr.msra.gmra.mrb[4].mxu0 %vm162_vm0, %v2546_v23  ;;  %v2558_v23 = vld [vmem:[%s3380_s8 + $0x8] sm:$0xff]  }
 0x3c9   :  { %2215 = vmatpush3.bf16.msra.mxu0 %v686_v20  ;;  %2218 = vmatprep.mubr.msk.bf16.mxu0 %vm162_vm0, %v2547_v24  ;;  %v2556_v20 = vld [vmem:[%s3380_s8] sm:$0xff]   ;;  %v2562_v24 = vld [vmem:[%s3380_s8 + $0x18] sm:$0xff]  }
 0x3ca   :  { %2216 = vmatprep.subr.bf16.mxu0 %v687_v25 }
 0x3cd   :  { %2217 = vmatpush3.bf16.msra.mxu0 %v687_v25  ;;  %v2564_v25 = vld [vmem:[%s3380_s8 + $0x20] sm:$0xff]  }
 0x3ce   :  { %2246 = vmatprep.subr.bf16.mxu0 %v2555_v53 }
 0x3d4   :  { %2219 = vmatmul.mubr.msk.bf16.vlgmr.msra.gmra.mrb[4].mxu0 %vm162_vm0, %v2548_v26  ;;  %v2566_v26 = vld [vmem:[%s3380_s8 + $0x28] sm:$0xff]  }
 0x3d5   :  { %2247 = vmatpush3.bf16.msra.mxu0 %v2555_v53  ;;  %v2027_v53 = vld [vmem:[%s3381_s9] ss:$0 sm:$0xff]  ;;  %s2709_s9 = smov 32  }
 0x3d6   :  { %2248 = vmatprep.subr.bf16.mxu0 %v2557_v54 }
 0x3d9   :  { %2249 = vmatpush3.bf16.msra.mxu0 %v2557_v54 }
 0x3da   :  { %2250 = vmatprep.subr.bf16.mxu0 %v2559_v55 }
 0x3dd   :  { %2251 = vmatpush3.bf16.msra.mxu0 %v2559_v55 }
 0x3de   :  { %2252 = vmatprep.subr.bf16.mxu0 %v2561_v56 }
 0x3e1   :  { %2253 = vmatpush3.bf16.msra.mxu0 %v2561_v56 }
 0x3e2   :  { %2254 = vmatprep.subr.bf16.mxu0 %v2563_v57 }
 0x3e5   :  { %2255 = vmatpush3.bf16.msra.mxu0 %v2563_v57 }
 0x3e6   :  { %2256 = vmatprep.subr.bf16.mxu0 %v2565_v58 }
 0x3e9   :  { %2257 = vmatpush3.bf16.msra.mxu0 %v2565_v58 }
 0x4a7   :  { %v2220_v30 = vpop.f32.mrb[4].mxu0 }
 0x4a8   :  { %v929_v31 = vadd.f32 %v2220_v30, %v920_v29  ;;  %v883_v32 = vpop.f32.mrb[5].mxu0  ;;  %v2569_v29 = vld [vmem:[%s3378_s6 + $0x38] sm:$0xff]  }
 0x4a9   :  { %v927_v34 = vadd.f32 %v910_v27, %v883_v32  ;;  %v2221_v35 = vpop.f32.mrb[6].mxu0  ;;  %v2567_v27 = vld [vmem:[%s3378_s6 + $0x30] sm:$0xff]   ;;  %v2570_v30 = vld [vmem:[%s3380_s8 + $0x38] sm:$0xff]  }
 0x4aa   :  { %v930_v36 = vadd.f32 %v2221_v35, %v925_v33  ;;  %v886_v37 = vpop.f32.mrb[7].mxu0  ;;  %v933_v40 = vmax.f32 %v929_v31, 0.0  ;;  %2258 = vmatprep.subr.bf16.mxu0 %v2567_v27 }
 0x4ab   :  { %v928_v39 = vadd.f32 %v915_v28, %v886_v37  ;;  %v931_v42 = vmax.f32 %v927_v34, 0.0  ;;  %v2568_v28 = vld [vmem:[%s3380_s8 + $0x30] sm:$0xff]   ;;  %2259 = vmatpush3.bf16.msra.mxu0 %v2567_v27 }
 0x4ac   :  { %v934_v41 = vmax.f32 %v930_v36, 0.0  ;;  %2260 = vmatprep.subr.bf16.mxu0 %v2569_v29 }
 0x4ad   :  { %v932_v43 = vmax.f32 %v928_v39, 0.0 }
 0x4ae   :  { %v2426_v44 = vpack.i.bf16 %v934_v41, %v933_v40  ;;  %v2986_v45 = vpack.c.bf16 %v934_v41, %v933_v40 }
 0x4af   :  { %v2421_v46 = vpack.i.bf16 %v932_v43, %v931_v42  ;;  %v935_v47 = vpack.c.bf16 %v932_v43, %v931_v42  ;;  %2261 = vmatpush3.bf16.msra.mxu0 %v2569_v29 }
 0x4b0   :  { %2427 = vrot.lane.b32.xlu0 %v2426_v44, %s2699_s20 }
 0x4b1   :  { %2422 = vrot.lane.b32.xlu1 %v2421_v46, %s2699_s20 }
 0x4b4   :  { %2437 = vrot.lane.b32.xlu0 %v2426_v44, %s2700_s7 }
 0x4b5   :  { %2432 = vrot.lane.b32.xlu1 %v2421_v46, %s2700_s7 }
 0x4b8   :  { %1187 = vperm.xlu0 %2379, %v2015_v49  }
 0x4b9   :  { %1182 = vperm.xlu1 %2380, %v2014_v50   ;;  %v2018_v50 = vld [vmem:[#allocation8] ss:$0 sm:$0xff] }
 0x4bc   :  { %1197 = vperm.xlu0 %2379, %v2017_v51  }
 0x4bd   :  { %1192 = vperm.xlu1 %2380, %v2016_v52  }
 0x522   :  { %v2428_v59 = vpop.permute.xlu0 %2427 }
 0x523   :  { %v2430_v60 = vunpack.i.h.bf16 %v2428_v59  ;;  %v2429_v61 = vunpack.i.l.bf16 %v2428_v59  ;;  %v2423_v62 = vpop.permute.xlu1 %2422 }
 0x524   :  { %v2425_v63 = vunpack.i.h.bf16 %v2423_v62  ;;  %v2424_v0 = vunpack.i.l.bf16 %v2423_v62 }
 0x525   :  { %v946_v1 = vpack.c.bf16 %v2430_v60, %v2429_v61 }
 0x526   :  { %v945_v2 = vpack.c.bf16 %v2425_v63, %v2424_v0  ;;  %v2438_v12 = vpop.permute.xlu0 %2437 }
 0x527   :  { %v948_v4 = vmul.bf16 %v946_v1, %v2869_v22  ;;  %v2433_v5 = vpop.permute.xlu1 %2432  ;;  %v2439_v13 = vunpack.i.l.bf16 %v2438_v12 }
 0x528   :  { %v947_v3 = vmul.bf16 %v945_v2, %v2869_v22  ;;  %v2435_v6 = vunpack.i.h.bf16 %v2433_v5  ;;  %v2434_v7 = vunpack.i.l.bf16 %v2433_v5  ;;  %v2440_v22 = vunpack.i.h.bf16 %v2438_v12 }
 0x52a   :  { %2222 = vmatprep.subr.bf16.mxu1 %v947_v3  ;;  %v957_v11 = vpack.c.bf16 %v2435_v6, %v2434_v7  ;;  %v958_v15 = vpack.c.bf16 %v2440_v22, %v2439_v13 }
 0x52b   :  { %2223 = vmatpush3.bf16.msra.mxu1 %v947_v3 }
 0x52c   :  { %2224 = vmatprep.subr.bf16.mxu1 %v948_v4  ;;  %v959_v14 = vmul.bf16 %v957_v11, %v2880_v38  ;;  %v960_v19 = vmul.bf16 %v958_v15, %v2880_v38  ;;  %v2560_v38 = vld [vmem:[%s3380_s8 + $0x10] sm:$0xff]   ;;  %s2705_s8 = smov 112  }
 0x52f   :  { %2225 = vmatpush3.bf16.msra.mxu1 %v948_v4 }
 0x530   :  { %2230 = vmatprep.subr.bf16.mxu1 %v935_v47 }
 0x532   :  { %2227 = vmatmul.mubr.msk.bf16.vlgmr.msra.gmra.mrb[4].mxu1 %vm162_vm0, %v2550_v8 }
 0x533   :  { %2231 = vmatpush3.bf16.msra.mxu1 %v935_v47  ;;  %2234 = vmatprep.mubr.msk.bf16.mxu1 %vm162_vm0, %v2551_v9 }
 0x534   :  { %2232 = vmatprep.subr.bf16.mxu1 %v2986_v45 }
 0x537   :  { %2233 = vmatpush3.bf16.msra.mxu1 %v2986_v45  ;;  %v1188_v32 = vpop.permute.xlu0 %1187 }
 0x538   :  { %2238 = vmatprep.subr.bf16.mxu1 %v959_v14  ;;  %v1183_v31 = vpop.permute.xlu1 %1182 }
 0x53b   :  { %v1198_v37 = vpop.permute.xlu0 %1197 }
 0x53c   :  { %v1193_v33 = vpop.permute.xlu1 %1192 }
 0x53e   :  { %2235 = vmatmul.mubr.msk.bf16.vlgmr.msra.gmra.mrb[4].mxu1 %vm162_vm0, %v2552_v16 }
 0x53f   :  { %2239 = vmatpush3.bf16.msra.mxu1 %v959_v14  ;;  %2242 = vmatprep.mubr.msk.bf16.mxu1 %vm162_vm0, %v2553_v17 }
 0x540   :  { %2240 = vmatprep.subr.bf16.mxu1 %v960_v19 }
 0x543   :  { %2241 = vmatpush3.bf16.msra.mxu1 %v960_v19 }
 0x544   :  { %2266 = vmatprep.subr.bf16.mxu1 %v2556_v20 }
 0x54a   :  { %2243 = vmatmul.mubr.msk.bf16.vlgmr.msra.gmra.mrb[4].mxu1 %vm162_vm0, %v2554_v21 }
 0x54b   :  { %2267 = vmatpush3.bf16.msra.mxu1 %v2556_v20 }
 0x54c   :  { %2268 = vmatprep.subr.bf16.mxu1 %v2558_v23 }
 0x54f   :  { %2269 = vmatpush3.bf16.msra.mxu1 %v2558_v23 }
 0x550   :  { %2270 = vmatprep.subr.bf16.mxu1 %v2560_v38 }
 0x553   :  { %2271 = vmatpush3.bf16.msra.mxu1 %v2560_v38 }
 0x554   :  { %2272 = vmatprep.subr.bf16.mxu1 %v2562_v24 }
 0x557   :  { %2273 = vmatpush3.bf16.msra.mxu1 %v2562_v24 }
 0x558   :  { %2274 = vmatprep.subr.bf16.mxu1 %v2564_v25 }
 0x55b   :  { %2275 = vmatpush3.bf16.msra.mxu1 %v2564_v25 }
 0x55c   :  { %2276 = vmatprep.subr.bf16.mxu1 %v2566_v26 }
 0x55f   :  { %2277 = vmatpush3.bf16.msra.mxu1 %v2566_v26 }
 0x560   :  { %2278 = vmatprep.subr.bf16.mxu1 %v2568_v28 }
 0x563   :  { %2279 = vmatpush3.bf16.msra.mxu1 %v2568_v28 }
 0x564   :  { %2280 = vmatprep.subr.bf16.mxu1 %v2570_v30 }
 0x567   :  { %2281 = vmatpush3.bf16.msra.mxu1 %v2570_v30 }
 0x61d   :  { %v2244_v34 = vpop.f32.mrb[4].mxu1 }
 0x61e   :  { %v1202_v35 = vadd.f32 %v2244_v34, %v1193_v33  ;;  %v1156_v36 = vpop.f32.mrb[5].mxu1 }
 0x61f   :  { %v1200_v39 = vadd.f32 %v1183_v31, %v1156_v36  ;;  %v2245_v40 = vpop.f32.mrb[6].mxu1  ;;  %v1603_v31 = vld [vmem:[%s3377_s5] sm:$0x1] }
 0x620   :  { %v1203_v41 = vadd.f32 %v2245_v40, %v1198_v37  ;;  %v1159_v42 = vpop.f32.mrb[7].mxu1  ;;  %v1206_v44 = vmax.f32 %v1202_v35, 0.0  ;;  %vm1604_vm3 = vcmp.gt.f32.partialorder %v1603_v31, 0.5 }
 0x621   :  { %v1201_v43 = vadd.f32 %v1188_v32, %v1159_v42  ;;  %v1204_v46 = vmax.f32 %v1200_v39, 0.0  ;;  %v1625_v32 = vsel %vm1604_vm3, 1, %v2701_v10 }
 0x622   :  { %v1207_v45 = vmax.f32 %v1203_v41, 0.0  ;;  %v1629_v33 = vrot.slane %v1625_v32, %v2866_v18 }
 0x623   :  { %v1205_v47 = vmax.f32 %v1201_v43, 0.0 }
 0x624   :  { %v1209_v48 = vpack.c.bf16 %v1207_v45, %v1206_v44  ;;  %vm1630_vm4 = vcmp.eq.s32.totalorder %v1629_v33, 1 }
 0x625   :  { %v1208_v49 = vpack.c.bf16 %v1205_v47, %v1204_v46 }
 0x627   :  { %2262 = vmatprep.mubr.bf16.mxu0 %v1208_v49  ;;  %2282 = vmatprep.mubr.bf16.mxu1 %v1208_v49 }
 0x628   :  { %2263 = vmatmul.mubr.bf16.vlgmr.msra.gmra.mrb[8].mxu0 %v1209_v48  ;;  %2283 = vmatmul.mubr.bf16.vlgmr.msra.gmra.mrb[8].mxu1 %v1209_v48 }
 0x6fb   :  { %v2264_v51 = vpop.f32.mrb[8].mxu0  ;;  %v2284_v52 = vpop.f32.mrb[8].mxu1 }
 0x6fc   :  { %v3085_v54 = vadd.f32 %v2264_v51, %v2018_v50  ;;  %v1315_v55 = vpop.f32.mrb[9].mxu0  ;;  %v1435_v56 = vpop.f32.mrb[9].mxu1  ;;  %v1444_v60 = vadd.f32 %v2284_v52, %v2027_v53 }
 0x6fd   :  { %v3087_v57 = vadd.f32 %v2018_v50, %v1315_v55  ;;  %v2265_v58 = vpop.f32.mrb[10].mxu0  ;;  %v2285_v59 = vpop.f32.mrb[10].mxu1  ;;  %v1436_v1 = vadd.f32 %v2027_v53, %v1435_v56 }
 0x6fe   :  { %1453 = vst.msk [vmem:[%s3385_s13 + $0x10] sm:$0xff] %vm1450_vm1, %v3085_v54  ;;  %v3094_v61 = vadd.f32 %v2265_v58, %v2018_v50  ;;  %v1447_v62 = vadd.f32 %v2285_v59, %v2027_v53  ;;  %v1318_v63 = vpop.f32.mrb[11].mxu0  ;;  %v1438_v0 = vpop.f32.mrb[11].mxu1 }
 0x6ff   :  { %1451 = vst.msk [vmem:[%s3385_s13] sm:$0xff] %vm1450_vm1, %v3087_v57  ;;  %v3101_v2 = vadd.f32 %v2018_v50, %v1318_v63  ;;  %v1439_v3 = vadd.f32 %v2027_v53, %v1438_v0 }
 0x700   :  { %1454 = vst.msk [vmem:[%s3385_s13 + $0x18] sm:$0xff] %vm1450_vm1, %v3094_v61  ;;  %v2446_v4 = vpack.i.bf16 %v1447_v62, %v1444_v60 }
 0x701   :  { %1452 = vst.msk [vmem:[%s3385_s13 + $0x8] sm:$0xff] %vm1450_vm1, %v3101_v2  ;;  %v2441_v5 = vpack.i.bf16 %v1439_v3, %v1436_v1 }
 0x702   :  { %2447 = vrot.lane.b32.xlu0 %v2446_v4, %s2702_s16 }
 0x703   :  { %2442 = vrot.lane.b32.xlu1 %v2441_v5, %s2702_s16 }
 0x774   :  { %v2448_v6 = vpop.permute.xlu0 %2447 }
 0x775   :  { %v2450_v7 = vunpack.i.h.bf16 %v2448_v6  ;;  %v2449_v8 = vunpack.i.l.bf16 %v2448_v6  ;;  %v2443_v9 = vpop.permute.xlu1 %2442 }
 0x776   :  { %v2445_v11 = vunpack.i.h.bf16 %v2443_v9  ;;  %v2444_v12 = vunpack.i.l.bf16 %v2443_v9 }
 0x777   :  { %v1587_v22 = vsel %vm1578_vm2, %v2449_v8, %v1444_v60  ;;  %v1590_v13 = vsel %vm1578_vm2, %v2450_v7, %v1447_v62 }
 0x778   :  { %v2456_v14 = vpack.i.bf16 %v1590_v13, %v1587_v22  ;;  %v1581_v15 = vsel %vm1578_vm2, %v2444_v12, %v1436_v1  ;;  %v1584_v16 = vsel %vm1578_vm2, %v2445_v11, %v1439_v3 }
 0x779   :  { %v2451_v17 = vpack.i.bf16 %v1584_v16, %v1581_v15  ;;  %v2064_v15 = vld [vmem:[%s3377_s5 + $0x1] sm:$0x1] }
 0x77a   :  { %2457 = vrot.lane.b32.xlu0 %v2456_v14, %s2702_s16  ;;  %vm1661_vm5 = vcmp.gt.f32.partialorder %v2064_v15, 0.5 }
 0x77b   :  { %2452 = vrot.lane.b32.xlu1 %v2451_v17, %s2702_s16  ;;  %v1682_v16 = vsel %vm1661_vm5, 1, %v2701_v10 }
 0x77c   :  { %v1686_v17 = vrot.slane %v1682_v16, %v2866_v18 }
 0x77e   :  { %vm1687_vm6 = vcmp.eq.s32.totalorder %v1686_v17, 1 }
 0x7ec   :  { %v2458_v19 = vpop.permute.xlu0 %2457 }
 0x7ed   :  { %v2460_v20 = vunpack.i.h.bf16 %v2458_v19  ;;  %v2459_v21 = vunpack.i.l.bf16 %v2458_v19  ;;  %v2453_v23 = vpop.permute.xlu1 %2452 }
 0x7ee   :  { %v2455_v38 = vunpack.i.h.bf16 %v2453_v23  ;;  %v2454_v24 = vunpack.i.l.bf16 %v2453_v23 }
 0x7ef   :  { %v1601_v25 = vsel %vm1578_vm2, %v2459_v21, %v1444_v60  ;;  %v1602_v26 = vsel %vm1578_vm2, %v2460_v20, %v1447_v62 }
 0x7f0   :  { %v2466_v27 = vpack.i.bf16 %v1602_v26, %v1601_v25  ;;  %v1599_v28 = vsel %vm1578_vm2, %v2454_v24, %v1436_v1  ;;  %v1600_v29 = vsel %vm1578_vm2, %v2455_v38, %v1439_v3 }
 0x7f1   :  { %v2461_v30 = vpack.i.bf16 %v1600_v29, %v1599_v28 }
 0x7f2   :  { %2467 = vrot.lane.b32.xlu0 %v2466_v27, %s2700_s7 }
 0x7f3   :  { %2462 = vrot.lane.b32.xlu1 %v2461_v30, %s2700_s7  ;;  %s2703_s7 = smov 126  }
 0x864   :  { %v2468_v34 = vpop.permute.xlu0 %2467 }
 0x865   :  { %v2470_v35 = vunpack.i.h.bf16 %v2468_v34  ;;  %v2469_v36 = vunpack.i.l.bf16 %v2468_v34  ;;  %v2463_v37 = vpop.permute.xlu1 %2462 }
 0x866   :  { %v2465_v39 = vunpack.i.h.bf16 %v2463_v37  ;;  %v2464_v40 = vunpack.i.l.bf16 %v2463_v37 }
 0x867   :  { %v1624_v41 = vmax.f32 %v1447_v62, %v2470_v35  ;;  %v1623_v42 = vmax.f32 %v1444_v60, %v2469_v36 }
 0x868   :  { %v1622_v43 = vmax.f32 %v1439_v3, %v2465_v39  ;;  %v1621_v44 = vmax.f32 %v1436_v1, %v2464_v40 }
 0x869   :  { %v1634_v45 = vsel %vm1630_vm4, %v1624_v41, %v1447_v62  ;;  %v1633_v46 = vsel %vm1630_vm4, %v1623_v42, %v1444_v60 }
 0x86a   :  { %v1632_v47 = vsel %vm1630_vm4, %v1622_v43, %v1439_v3  ;;  %v1631_v48 = vsel %vm1630_vm4, %v1621_v44, %v1436_v1  ;;  %v2476_v49 = vpack.i.bf16 %v1634_v45, %v1633_v46 }
 0x86b   :  { %v2471_v50 = vpack.i.bf16 %v1632_v47, %v1631_v48 }
 0x86c   :  { %2477 = vrot.lane.b32.xlu0 %v2476_v49, %s2702_s16  ;;  %v2572_v49 = vld [vmem:[%s3384_s12 + $0x8] sm:$0xff]  }
 0x86d   :  { %2472 = vrot.lane.b32.xlu1 %v2471_v50, %s2702_s16  ;;  %v2573_v50 = vld [vmem:[%s3384_s12 + $0x10] sm:$0xff]  }
 0x8de   :  { %v2478_v51 = vpop.permute.xlu0 %2477 }
 0x8df   :  { %v2480_v52 = vunpack.i.h.bf16 %v2478_v51  ;;  %v2479_v53 = vunpack.i.l.bf16 %v2478_v51  ;;  %v2473_v55 = vpop.permute.xlu1 %2472  ;;  %v2574_v51 = vld [vmem:[%s3384_s12 + $0x18] sm:$0xff]  }
 0x8e0   :  { %v2475_v56 = vunpack.i.h.bf16 %v2473_v55  ;;  %v2474_v58 = vunpack.i.l.bf16 %v2473_v55 }
 0x8e1   :  { %v1643_v59 = vsel %vm1578_vm2, %v2479_v53, %v1633_v46  ;;  %v1646_v63 = vsel %vm1578_vm2, %v2480_v52, %v1634_v45 }
 0x8e2   :  { %v2486_v62 = vpack.i.bf16 %v1646_v63, %v1643_v59  ;;  %v1637_v60 = vsel %vm1578_vm2, %v2474_v58, %v1631_v48  ;;  %v1640_v0 = vsel %vm1578_vm2, %v2475_v56, %v1632_v47 }
 0x8e3   :  { %v2481_v1 = vpack.i.bf16 %v1640_v0, %v1637_v60 }
 0x8e4   :  { %2487 = vrot.lane.b32.xlu0 %v2486_v62, %s2702_s16 }
 0x8e5   :  { %2482 = vrot.lane.b32.xlu1 %v2481_v1, %s2702_s16 }
 0x956   :  { %v2488_v3 = vpop.permute.xlu0 %2487 }
 0x957   :  { %v2490_v4 = vunpack.i.h.bf16 %v2488_v3  ;;  %v2489_v5 = vunpack.i.l.bf16 %v2488_v3  ;;  %v2483_v6 = vpop.permute.xlu1 %2482 }
 0x958   :  { %v2485_v7 = vunpack.i.h.bf16 %v2483_v6  ;;  %v2484_v8 = vunpack.i.l.bf16 %v2483_v6 }
 0x959   :  { %v1657_v9 = vsel %vm1578_vm2, %v2489_v5, %v1633_v46  ;;  %v1658_v11 = vsel %vm1578_vm2, %v2490_v4, %v1634_v45  ;;  %v1842_v4 = vld [vmem:[%s3383_s11] sm:$0xff]  ;;  %s2708_s11 = smov 48  }
 0x95a   :  { %v2496_v12 = vpack.i.bf16 %v1658_v11, %v1657_v9  ;;  %v1655_v22 = vsel %vm1578_vm2, %v2484_v8, %v1631_v48  ;;  %v1656_v13 = vsel %vm1578_vm2, %v2485_v7, %v1632_v47  ;;  %v2065_v5 = vld [vmem:[%s3377_s5 + $0x2] sm:$0x1] }
 0x95b   :  { %v2491_v14 = vpack.i.bf16 %v1656_v13, %v1655_v22  ;;  %vm1718_vm7 = vcmp.gt.f32.partialorder %v2065_v5, 0.5 }
 0x95c   :  { %2497 = vrot.lane.b32.xlu0 %v2496_v12, %s2703_s7  ;;  %v1739_v6 = vsel %vm1718_vm7, 1, %v2701_v10 }
 0x95d   :  { %2492 = vrot.lane.b32.xlu1 %v2491_v14, %s2703_s7  ;;  %v1743_v7 = vrot.slane %v1739_v6, %v2866_v18 }
 0x95f   :  { %vm1744_vm8 = vcmp.eq.s32.totalorder %v1743_v7, 1 }
 0x9ce   :  { %v2498_v19 = vpop.permute.xlu0 %2497 }
 0x9cf   :  { %v2500_v20 = vunpack.i.h.bf16 %v2498_v19  ;;  %v2499_v21 = vunpack.i.l.bf16 %v2498_v19  ;;  %v2493_v23 = vpop.permute.xlu1 %2492 }
 0x9d0   :  { %v2495_v38 = vunpack.i.h.bf16 %v2493_v23  ;;  %v2494_v24 = vunpack.i.l.bf16 %v2493_v23 }
 0x9d1   :  { %v1681_v25 = vmax.f32 %v1634_v45, %v2500_v20  ;;  %v1680_v26 = vmax.f32 %v1633_v46, %v2499_v21 }
 0x9d2   :  { %v1679_v27 = vmax.f32 %v1632_v47, %v2495_v38  ;;  %v1678_v28 = vmax.f32 %v1631_v48, %v2494_v24 }
 0x9d3   :  { %v3149_v29 = vsel %vm1687_vm6, %v1681_v25, %v1634_v45  ;;  %v3151_v30 = vsel %vm1687_vm6, %v1680_v26, %v1633_v46 }
 0x9d4   :  { %v3153_v31 = vsel %vm1687_vm6, %v1679_v27, %v1632_v47  ;;  %v3155_v32 = vsel %vm1687_vm6, %v1678_v28, %v1631_v48  ;;  %v2506_v33 = vpack.i.bf16 %v3149_v29, %v3151_v30  ;;  %v2571_v48 = vld [vmem:[%s3384_s12] sm:$0xff]   ;;  %s2704_s12 = smov 124  }
 0x9d5   :  { %v2501_v34 = vpack.i.bf16 %v3153_v31, %v3155_v32  ;;  %2286 = vmatprep.subr.bf16.mxu0 %v2571_v48 }
 0x9d6   :  { %2507 = vrot.lane.b32.xlu0 %v2506_v33, %s2702_s16  ;;  %2287 = vmatpush3.bf16.msra.mxu0 %v2571_v48 }
 0x9d7   :  { %2502 = vrot.lane.b32.xlu1 %v2501_v34, %s2702_s16  ;;  %2288 = vmatprep.subr.bf16.mxu0 %v2572_v49 }
 0x9da   :  { %2289 = vmatpush3.bf16.msra.mxu0 %v2572_v49  ;;  %v2711_v49 = vmov 0.0  }
 0x9db   :  { %2290 = vmatprep.subr.bf16.mxu0 %v2573_v50  ;;  %2298 = vmatprep.subr.bf16.mxu1 %v2711_v49 }
 0x9dc   :  { %2302 = vmatprep.mubr.msk.bf16.mxu1 %vm2712_vm10, %v2711_v49 }
 0x9de   :  { %2291 = vmatpush3.bf16.msra.mxu0 %v2573_v50 }
 0x9df   :  { %2292 = vmatprep.subr.bf16.mxu0 %v2574_v51 }
 0x9e2   :  { %2293 = vmatpush3.bf16.msra.mxu0 %v2574_v51 }
 0xa48   :  { %v2508_v35 = vpop.permute.xlu0 %2507 }
 0xa49   :  { %v2510_v36 = vunpack.i.h.bf16 %v2508_v35  ;;  %v2509_v37 = vunpack.i.l.bf16 %v2508_v35  ;;  %v2503_v39 = vpop.permute.xlu1 %2502 }
 0xa4a   :  { %v2505_v40 = vunpack.i.h.bf16 %v2503_v39  ;;  %v2504_v41 = vunpack.i.l.bf16 %v2503_v39 }
 0xa4b   :  { %v1700_v42 = vsel %vm1578_vm2, %v2509_v37, %v3151_v30  ;;  %v1703_v43 = vsel %vm1578_vm2, %v2510_v36, %v3149_v29 }
 0xa4c   :  { %v2516_v44 = vpack.i.bf16 %v1703_v43, %v1700_v42  ;;  %v1694_v45 = vsel %vm1578_vm2, %v2504_v41, %v3155_v32  ;;  %v1697_v46 = vsel %vm1578_vm2, %v2505_v40, %v3153_v31 }
 0xa4d   :  { %v2511_v47 = vpack.i.bf16 %v1697_v46, %v1694_v45 }
 0xa4e   :  { %2517 = vrot.lane.b32.xlu0 %v2516_v44, %s2702_s16 }
 0xa4f   :  { %2512 = vrot.lane.b32.xlu1 %v2511_v47, %s2702_s16 }
 0xac0   :  { %v2518_v52 = vpop.permute.xlu0 %2517 }
 0xac1   :  { %v2520_v53 = vunpack.i.h.bf16 %v2518_v52  ;;  %v2519_v55 = vunpack.i.l.bf16 %v2518_v52  ;;  %v2513_v56 = vpop.permute.xlu1 %2512 }
 0xac2   :  { %v2515_v58 = vunpack.i.h.bf16 %v2513_v56  ;;  %v2514_v59 = vunpack.i.l.bf16 %v2513_v56 }
 0xac3   :  { %v1714_v63 = vsel %vm1578_vm2, %v2519_v55, %v3151_v30  ;;  %v1715_v62 = vsel %vm1578_vm2, %v2520_v53, %v3149_v29 }
 0xac4   :  { %v2526_v60 = vpack.i.bf16 %v1715_v62, %v1714_v63  ;;  %v1712_v0 = vsel %vm1578_vm2, %v2514_v59, %v3155_v32  ;;  %v1713_v1 = vsel %vm1578_vm2, %v2515_v58, %v3153_v31  ;;  %v1839_v58 = vld [vmem:[%s3382_s10] sm:$0xf] }
 0xac5   :  { %v2521_v3 = vpack.i.bf16 %v1713_v1, %v1712_v0 }
 0xac6   :  { %2527 = vrot.lane.b32.xlu0 %v2526_v60, %s2704_s12 }
 0xac7   :  { %2522 = vrot.lane.b32.xlu1 %v2521_v3, %s2704_s12 }
 0xaca   :  { %1459 = vrot.lane.b32.xlu0 %v3087_v57, %s2705_s8 }
 0xacb   :  { %1845 = vperm.xlu1 %2380, %v1842_v4  }
 0xace   :  { %1463 = vrot.lane.b32.xlu0 %v3085_v54, %s2705_s8 }
 0xacf   :  { %1461 = vrot.lane.b32.xlu1 %v3101_v2, %s2705_s8 }
 0xad2   :  { %1476 = vrot.lane.b32.xlu0 %v3087_v57, %s2706_s4 }
 0xad3   :  { %1465 = vrot.lane.b32.xlu1 %v3094_v61, %s2705_s8 }
 0xad6   :  { %1480 = vrot.lane.b32.xlu0 %v3085_v54, %s2706_s4 }
 0xad7   :  { %1478 = vrot.lane.b32.xlu1 %v3101_v2, %s2706_s4 }
 0xada   :  { %1493 = vrot.lane.b32.xlu0 %v3087_v57, %s2707_s25 }
 0xadb   :  { %1482 = vrot.lane.b32.xlu1 %v3094_v61, %s2706_s4 }
 0xade   :  { %1497 = vrot.lane.b32.xlu0 %v3085_v54, %s2707_s25 }
 0xadf   :  { %1495 = vrot.lane.b32.xlu1 %v3101_v2, %s2707_s25 }
 0xae2   :  { %1510 = vrot.lane.b32.xlu0 %v3087_v57, %s2702_s16 }
 0xae3   :  { %1499 = vrot.lane.b32.xlu1 %v3094_v61, %s2707_s25 }
 0xae6   :  { %1514 = vrot.lane.b32.xlu0 %v3085_v54, %s2702_s16 }
 0xae7   :  { %1512 = vrot.lane.b32.xlu1 %v3101_v2, %s2702_s16 }
 0xaea   :  { %1527 = vrot.lane.b32.xlu0 %v3087_v57, %s2708_s11 }
 0xaeb   :  { %1516 = vrot.lane.b32.xlu1 %v3094_v61, %s2702_s16 }
 0xaee   :  { %1531 = vrot.lane.b32.xlu0 %v3085_v54, %s2708_s11 }
 0xaef   :  { %1529 = vrot.lane.b32.xlu1 %v3101_v2, %s2708_s11 }
 0xaf2   :  { %1544 = vrot.lane.b32.xlu0 %v3087_v57, %s2709_s9 }
 0xaf3   :  { %1533 = vrot.lane.b32.xlu1 %v3094_v61, %s2708_s11 }
 0xaf6   :  { %1548 = vrot.lane.b32.xlu0 %v3085_v54, %s2709_s9 }
 0xaf7   :  { %1546 = vrot.lane.b32.xlu1 %v3101_v2, %s2709_s9 }
 0xafa   :  { %1561 = vrot.lane.b32.xlu0 %v3087_v57, %s2710_s18 }
 0xafb   :  { %1550 = vrot.lane.b32.xlu1 %v3094_v61, %s2709_s9 }
 0xafe   :  { %1565 = vrot.lane.b32.xlu0 %v3085_v54, %s2710_s18 }
 0xaff   :  { %1563 = vrot.lane.b32.xlu1 %v3101_v2, %s2710_s18 }
 0xb03   :  { %1567 = vrot.lane.b32.xlu1 %v3094_v61, %s2710_s18 }
 0xb38   :  { %v2528_v8 = vpop.permute.xlu0 %2527 }
 0xb39   :  { %v2530_v9 = vunpack.i.h.bf16 %v2528_v8  ;;  %v2529_v57 = vunpack.i.l.bf16 %v2528_v8  ;;  %v2523_v11 = vpop.permute.xlu1 %2522 }
 0xb3a   :  { %v2525_v12 = vunpack.i.h.bf16 %v2523_v11  ;;  %v2524_v54 = vunpack.i.l.bf16 %v2523_v11 }
 0xb3b   :  { %v1738_v2 = vmax.f32 %v3149_v29, %v2530_v9  ;;  %v1737_v61 = vmax.f32 %v3151_v30, %v2529_v57 }
 0xb3c   :  { %v1736_v22 = vmax.f32 %v3153_v31, %v2525_v12  ;;  %v1735_v13 = vmax.f32 %v3155_v32, %v2524_v54  ;;  %v1460_v14 = vpop.permute.xlu0 %1459 }
 0xb3d   :  { %v1748_v10 = vsel %vm1744_vm8, %v1738_v2, %v3149_v29  ;;  %v1747_v18 = vsel %vm1744_vm8, %v1737_v61, %v3151_v30  ;;  %2036 = vst.msk [vmem:[%s3385_s13 + $0x20] sm:$0xff] %vm1450_vm1, %v1460_v14 }
 0xb3e   :  { %v1746_v15 = vsel %vm1744_vm8, %v1736_v22, %v3153_v31  ;;  %v1745_v16 = vsel %vm1744_vm8, %v1735_v13, %v3155_v32  ;;  %v1750_v19 = vpack.c.bf16 %v1748_v10, %v1747_v18 }
 0xb3f   :  { %v1749_v17 = vpack.c.bf16 %v1746_v15, %v1745_v16 }
 0xb40   :  { %v1464_v20 = vpop.permute.xlu0 %1463 }
 0xb41   :  { %2038 = vst.msk [vmem:[%s3385_s13 + $0x30] sm:$0xff] %vm1450_vm1, %v1464_v20  ;;  %2294 = vmatprep.mubr.msk.bf16.mxu0 %vm1783_vm9, %v1749_v17 }
 0xb42   :  { %2295 = vmatmul.mubr.msk.bf16.vlgmr.msra.gmra.mrb[12].mxu0 %vm1783_vm9, %v1750_v19 }
 0xb44   :  { %v1477_v21 = vpop.permute.xlu0 %1476 }
 0xb45   :  { %2040 = vst.msk [vmem:[%s3385_s13 + $0x40] sm:$0xff] %vm1450_vm1, %v1477_v21 }
 0xb48   :  { %v1481_v23 = vpop.permute.xlu0 %1480 }
 0xb49   :  { %2042 = vst.msk [vmem:[%s3385_s13 + $0x50] sm:$0xff] %vm1450_vm1, %v1481_v23 }
 0xb4a   :  { %v3257_v38 = vpop.permute.xlu1 %1845 }
 0xb4c   :  { %v1494_v24 = vpop.permute.xlu0 %1493 }
 0xb4d   :  { %2044 = vst.msk [vmem:[%s3385_s13 + $0x60] sm:$0xff] %vm1450_vm1, %v1494_v24 }
 0xb4e   :  { %v1462_v25 = vpop.permute.xlu1 %1461 }
 0xb4f   :  { %2037 = vst.msk [vmem:[%s3385_s13 + $0x28] sm:$0xff] %vm1450_vm1, %v1462_v25 }
 0xb50   :  { %v1498_v26 = vpop.permute.xlu0 %1497 }
 0xb51   :  { %2046 = vst.msk [vmem:[%s3385_s13 + $0x70] sm:$0xff] %vm1450_vm1, %v1498_v26 }
 0xb52   :  { %v1466_v27 = vpop.permute.xlu1 %1465 }
 0xb53   :  { %2039 = vst.msk [vmem:[%s3385_s13 + $0x38] sm:$0xff] %vm1450_vm1, %v1466_v27 }
 0xb54   :  { %v1511_v28 = vpop.permute.xlu0 %1510 }
 0xb55   :  { %2048 = vst.msk [vmem:[%s3385_s13 + $0x80] sm:$0xff] %vm1450_vm1, %v1511_v28 }
 0xb56   :  { %v1479_v29 = vpop.permute.xlu1 %1478 }
 0xb57   :  { %2041 = vst.msk [vmem:[%s3385_s13 + $0x48] sm:$0xff] %vm1450_vm1, %v1479_v29 }
 0xb58   :  { %v1515_v30 = vpop.permute.xlu0 %1514 }
 0xb59   :  { %2050 = vst.msk [vmem:[%s3385_s13 + $0x90] sm:$0xff] %vm1450_vm1, %v1515_v30 }
 0xb5a   :  { %v1483_v31 = vpop.permute.xlu1 %1482 }
 0xb5b   :  { %2043 = vst.msk [vmem:[%s3385_s13 + $0x58] sm:$0xff] %vm1450_vm1, %v1483_v31 }
 0xb5c   :  { %v1528_v32 = vpop.permute.xlu0 %1527 }
 0xb5d   :  { %2052 = vst.msk [vmem:[%s3385_s13 + $0xa0] sm:$0xff] %vm1450_vm1, %v1528_v32 }
 0xb5e   :  { %v1496_v33 = vpop.permute.xlu1 %1495 }
 0xb5f   :  { %2045 = vst.msk [vmem:[%s3385_s13 + $0x68] sm:$0xff] %vm1450_vm1, %v1496_v33 }
 0xb60   :  { %v1532_v34 = vpop.permute.xlu0 %1531 }
 0xb61   :  { %2054 = vst.msk [vmem:[%s3385_s13 + $0xb0] sm:$0xff] %vm1450_vm1, %v1532_v34 }
 0xb62   :  { %v1500_v35 = vpop.permute.xlu1 %1499 }
 0xb63   :  { %2047 = vst.msk [vmem:[%s3385_s13 + $0x78] sm:$0xff] %vm1450_vm1, %v1500_v35 }
 0xb64   :  { %v1545_v36 = vpop.permute.xlu0 %1544 }
 0xb65   :  { %2056 = vst.msk [vmem:[%s3385_s13 + $0xc0] sm:$0xff] %vm1450_vm1, %v1545_v36 }
 0xb66   :  { %v1513_v37 = vpop.permute.xlu1 %1512 }
 0xb67   :  { %2049 = vst.msk [vmem:[%s3385_s13 + $0x88] sm:$0xff] %vm1450_vm1, %v1513_v37 }
 0xb68   :  { %v1549_v39 = vpop.permute.xlu0 %1548 }
 0xb69   :  { %2058 = vst.msk [vmem:[%s3385_s13 + $0xd0] sm:$0xff] %vm1450_vm1, %v1549_v39 }
 0xb6a   :  { %v1517_v40 = vpop.permute.xlu1 %1516 }
 0xb6b   :  { %2051 = vst.msk [vmem:[%s3385_s13 + $0x98] sm:$0xff] %vm1450_vm1, %v1517_v40 }
 0xb6c   :  { %v1562_v41 = vpop.permute.xlu0 %1561 }
 0xb6d   :  { %2060 = vst.msk [vmem:[%s3385_s13 + $0xe0] sm:$0xff] %vm1450_vm1, %v1562_v41 }
 0xb6e   :  { %v1530_v42 = vpop.permute.xlu1 %1529 }
 0xb6f   :  { %2053 = vst.msk [vmem:[%s3385_s13 + $0xa8] sm:$0xff] %vm1450_vm1, %v1530_v42 }
 0xb70   :  { %v1566_v43 = vpop.permute.xlu0 %1565 }
 0xb71   :  { %2062 = vst.msk [vmem:[%s3385_s13 + $0xf0] sm:$0xff] %vm1450_vm1, %v1566_v43 }
 0xb72   :  { %v1534_v44 = vpop.permute.xlu1 %1533 }
 0xb73   :  { %2055 = vst.msk [vmem:[%s3385_s13 + $0xb8] sm:$0xff] %vm1450_vm1, %v1534_v44 }
 0xb76   :  { %v1547_v45 = vpop.permute.xlu1 %1546 }
 0xb77   :  { %2057 = vst.msk [vmem:[%s3385_s13 + $0xc8] sm:$0xff] %vm1450_vm1, %v1547_v45 }
 0xb7a   :  { %v1551_v46 = vpop.permute.xlu1 %1550 }
 0xb7b   :  { %2059 = vst.msk [vmem:[%s3385_s13 + $0xd8] sm:$0xff] %vm1450_vm1, %v1551_v46 }
 0xb7e   :  { %v1564_v47 = vpop.permute.xlu1 %1563 }
 0xb7f   :  { %2061 = vst.msk [vmem:[%s3385_s13 + $0xe8] sm:$0xff] %vm1450_vm1, %v1564_v47 }
 0xb82   :  { %v1568_v48 = vpop.permute.xlu1 %1567 }
 0xb83   :  { %2063 = vst.msk [vmem:[%s3385_s13 + $0xf8] sm:$0xff] %vm1450_vm1, %v1568_v48  ;;  %s2713_s13 = smov [#allocation10]  }
 0xb84   :  { %s1901_s0 = sshll.u32 %s2713_s13, 4  ;;  %s1902_s0 = int_to_ptr.vmem [resolvable:$true] %s1901_s0 }
 0xb85   :  { %s2663_s16 = scalar_lea.vmem %s1902_s0, 128  ;;  %p2668_p5 = scmp.lt.s32.totalorder %s1902_s0, %s1902_s0 }
 0xb86   :  { %p2664_p4 = scmp.ne.s32.totalorder %s1902_s0, %s2663_s16  ;;  %p2669_p6 = scmp.lt.s32.totalorder %s2663_s16, %s2663_s16 }
 0xb88   :  { %p2670_p7 = por %p2669_p6, %p2668_p5 }
 0xb8a   :  { %p2671_p8 = pnand %p2670_p7, %p2664_p4 }
 0xc15   :  { %v2296_v50 = vpop.f32.mrb[12].mxu0 }
 0xc16   :  { %v1824_v51 = vpop.f32.mrb[13].mxu0 }
 0xc17   :  { %v2297_v52 = vpop.f32.mrb[14].mxu0 }
 0xc18   :  { %v1841_v53 = vpack.c.bf16 %v2297_v52, %v2296_v50  ;;  %v1827_v55 = vpop.f32.mrb[15].mxu0 }
 0xc19   :  { %v1840_v56 = vpack.c.bf16 %v1827_v55, %v1824_v51 }
 0xc1b   :  { %2299 = vmatpush3.bf16.msra.mxu1 %v1840_v56 }
 0xc1c   :  { %2300 = vmatprep.subr.bf16.mxu1 %v2711_v49 }
 0xc1f   :  { %2301 = vmatpush3.bf16.msra.mxu1 %v1841_v53 }
 0xc22   :  { %2303 = vmatmul.mubr.msk.bf16.vlgmr.msra.gmra.mrb[12].mxu1 %vm162_vm0, %v1839_v58 }
 0xcf5   :  { %v1885_v59 = vpop.f32.mrb[12].mxu1 }
 0xcf6   :  { %v1886_v63 = vadd.f32 %v1885_v59, %v3257_v38  ;;  %v2304_v62 = vpop.f32.mrb[13].mxu1 }
 0xcf7   :  { %v1888_v60 = vpop.f32.mrb[14].mxu1 }
 0xcf8   :  { %v2305_v0 = vpop.f32.mrb[15].mxu1  ;;  %1892 = vst.msk [vmem:[#allocation10] sm:$0xff] %vm1891_vm11, %v1886_v63 }
 0xcf9   :  { %2674 = shalt.err (!%p2671_p8)
}
 0xcfa   :  { %s2675_s1 = scalar_lea.hbm %s3386_s14, 128 }
 0xcfb   :  { %p2676_p9 = scmp.ne.s32.totalorder %s3386_s14, %s2675_s1  ;;  %p2679_p10 = scmp.lt.u32.totalorder %s2675_s1, %s3386_s14 }
 0xcfd   :  { %p2681_p11 = pnand %p2679_p10, %p2676_p9 }
 0xcff   :  { %2684 = shalt.err (!%p2681_p11)
}
 0xd00   :  { %1904 = dma.vmem_to_hbm [thread:$0]  %s1902_s0, 128, %s3386_s14, [#allocation4]  }
 0xd01   :  { %2691 = dma.done.wait [#allocation4], 128  }
 0xd02   :  { %2692 = vsyncadd [#allocation4], 4294967168 }
 0xd03   :  { %1910 = vsyncpa [#allocation3], 1 }
 0xd04   :  { %1911 = vsyncpa [#allocation6], 1 }
 0xd05   :  { %1912 = vsyncpa [#allocation9], 1 }
 0xd06   :  { %1913 = vsyncpa [#allocation4], 1 }

</bundles_post_ra>
